<compile_context>
chip_gen: v7x
topology: tpu7x:2x2x1
jax: 0.10.0
libtpu: 0.0.40
codegen_flags: <defaults>
</compile_context>

<pallas_src>
import numpy as np
import jax
import jax.numpy as jnp
from jax.experimental import pallas as pl
from jax.experimental.pallas import tpu as pltpu


# ----------------------------------------------------------------------------
# Fused Pallas kernel: conv1 -> pool1 -> conv2 -> pool2 -> classifier
# (TB images per grid step, everything stays in VMEM/vregs)
# ----------------------------------------------------------------------------
def _fspredictor_kernel(x_ref, w1_ref, b1_ref, s1_ref, t1_ref, sh1_ref,
                        w2_ref, b2_ref, s2_ref, t2_ref, mn_ref, cb_ref,
                        out_ref):
    f32, bf16 = jnp.float32, jnp.bfloat16

    # --- conv1 + ReLU: one GEMM, dh taps K-stacked on the host -------------
    # x_ref: [TB*H, 3*W*Cin] bf16 ; w1_ref: [3*W*Cin, W*C1] bf16
    y1 = jnp.maximum(
        jnp.dot(x_ref[...], w1_ref[...], preferred_element_type=f32)
        + b1_ref[...], 0.0)                               # [TB*H, W*C1] f32
    y1b = y1.astype(bf16)

    # --- maxpool-1: block-diagonal 0/1 row / column selection matmuls ------
    rp1 = jnp.maximum(jnp.dot(s1_ref[0], y1b, preferred_element_type=f32),
                      jnp.dot(s1_ref[1], y1b, preferred_element_type=f32)
                      ).astype(bf16)                      # [TB*H2, W*C1]
    p1 = jnp.maximum(jnp.dot(rp1, t1_ref[0], preferred_element_type=f32),
                     jnp.dot(rp1, t1_ref[1], preferred_element_type=f32)
                     ).astype(bf16)                       # [TB*H2, W2*C1]

    # --- conv2 + ReLU: dh row shifts via block-diag selectors (no slices) --
    acc = None
    for dh in range(3):
        plane = jnp.dot(sh1_ref[dh], p1,
                        preferred_element_type=f32).astype(bf16)
        part = jnp.dot(plane, w2_ref[dh], preferred_element_type=f32)
        acc = part if acc is None else acc + part
    y2 = jnp.maximum(acc + b2_ref[...], 0.0).astype(bf16)  # [TB*H2, W2*C2]

    # --- maxpool-2: row selectors emit rows r-major for the classifier -----
    rp2 = jnp.maximum(jnp.dot(s2_ref[0], y2, preferred_element_type=f32),
                      jnp.dot(s2_ref[1], y2, preferred_element_type=f32)
                      ).astype(bf16)                      # [H4*TB, W2*C2]
    emb = jnp.maximum(jnp.dot(rp2, t2_ref[0], preferred_element_type=f32),
                      jnp.dot(rp2, t2_ref[1], preferred_element_type=f32))
                                                          # [H4*TB, W4*C2] f32

    # --- classifier: pre-normalized, 128-lane-padded prototypes ------------
    tb = out_ref.shape[0]
    logits = cb_ref[...]                                  # [1, NCP] f32
    for r in range(mn_ref.shape[0]):                      # H//4 static blocks
        logits = logits + jnp.dot(emb[r * tb:(r + 1) * tb, :], mn_ref[r],
                                  preferred_element_type=f32)
    out_ref[...] = logits                                 # [TB, NCP] lane-dense


# ----------------------------------------------------------------------------
# Host-side (init-time) packing of parameters into kernel-friendly operands
# ----------------------------------------------------------------------------
def _band_weights(w_hwio, width):
    """3x3 SAME conv as 3 block-banded matrices (dw taps folded into the band)."""
    kh, kw, cin, cout = w_hwio.shape
    w = np.asarray(w_hwio, np.float32)
    big = np.zeros((kh, width * cin, width * cout), np.float32)
    for dh in range(kh):
        for dw in range(kw):
            for wo in range(width):
                wi = wo + dw - 1
                if 0 <= wi < width:
                    big[dh, wi * cin:(wi + 1) * cin,
                        wo * cout:(wo + 1) * cout] = w[dh, dw]
    return big


def _pool_row_selectors(tb, h_in):
    """Block-diagonal 0/1 S[k] with (S[k] @ Y)[img*h/2+i] = Y[img*h + 2i + k]."""
    h_out = h_in // 2
    s = np.zeros((2, tb * h_out, tb * h_in), np.float32)
    for k in range(2):
        for img in range(tb):
            for i in range(h_out):
                s[k, img * h_out + i, img * h_in + 2 * i + k] = 1.0
    return s


def _pool_row_selectors_rmajor(tb, h_in):
    """Like _pool_row_selectors but output rows ordered r-major: row r*tb + img."""
    h_out = h_in // 2
    s = np.zeros((2, h_out * tb, tb * h_in), np.float32)
    for k in range(2):
        for r in range(h_out):
            for img in range(tb):
                s[k, r * tb + img, img * h_in + 2 * r + k] = 1.0
    return s


def _shift_row_selectors(tb, h):
    """Block-diagonal 0/1 Sh[dh]: out row (img, i) = in row (img, i+dh-1) or zero."""
    sh = np.zeros((3, tb * h, tb * h), np.float32)
    for dh in range(3):
        for img in range(tb):
            for i in range(h):
                j = i + dh - 1
                if 0 <= j < h:
                    sh[dh, img * h + i, img * h + j] = 1.0
    return sh


def _col_selectors(w_in, c):
    """0/1 T[k] with (Y @ T[k])[:, wp*c+ch] = Y[:, (2*wp+k)*c + ch]."""
    w_out = w_in // 2
    t = np.zeros((2, w_in * c, w_out * c), np.float32)
    for k in range(2):
        for wp in range(w_out):
            for ch in range(c):
                t[k, (2 * wp + k) * c + ch, wp * c + ch] = 1.0
    return t


def pack_params(w1, b1, w2, b2, mat, bias, height, width, tb=8, nc_pad=128):
    assert height % 4 == 0 and width % 4 == 0
    c_in, c1 = w1.shape[2], w1.shape[3]
    c2 = w2.shape[3]
    h2, w2d = height // 2, width // 2
    h4, w4 = height // 4, width // 4
    nc, emb_dim = np.asarray(mat).shape
    assert emb_dim == h4 * w4 * c2
    ncp = max(nc_pad, nc)
    bf16, f32 = jnp.bfloat16, jnp.float32

    # conv weights: block-banded; conv1's three dh taps K-stacked into one matrix
    w1band = _band_weights(w1, width).reshape(3 * width * c_in, width * c1)
    w2band = _band_weights(w2, w2d)                       # [3, w2d*c1, w2d*c2]

    # prototype normalization hoisted out of the kernel (+ eps guard), class dim
    # padded to 128 lanes, reshaped to match emb's r-major [h4, w4*c2] layout.
    m = np.asarray(mat, np.float32)
    norms = np.maximum(np.linalg.norm(m, axis=1, keepdims=True), 1e-12)
    mn = np.zeros((emb_dim, ncp), np.float32)
    mn[:, :nc] = (m / norms).T
    cb = np.zeros((1, ncp), np.float32)
    cb[0, :nc] = np.asarray(bias, np.float32)

    return {
        "w1band": jnp.asarray(w1band, bf16),
        "b1": jnp.asarray(np.tile(np.asarray(b1, np.float32), width)
                          .reshape(1, width * c1), f32),
        "s1": jnp.asarray(_pool_row_selectors(tb, height), bf16),
        "t1": jnp.asarray(_col_selectors(width, c1), bf16),
        "sh1": jnp.asarray(_shift_row_selectors(tb, h2), bf16),
        "w2band": jnp.asarray(w2band, bf16),
        "b2": jnp.asarray(np.tile(np.asarray(b2, np.float32), w2d)
                          .reshape(1, w2d * c2), f32),
        "s2": jnp.asarray(_pool_row_selectors_rmajor(tb, h2), bf16),
        "t2": jnp.asarray(_col_selectors(w2d, c2), bf16),
        "mn": jnp.asarray(mn.reshape(h4, w4 * c2, ncp), f32),
        "cbias": jnp.asarray(cb, f32),
    }


def fspredictor_forward(x_nchw, packed):
    """x: [B, C, H, W] -> padded logits [B, NC_PAD]; one fused Pallas kernel."""
    B, c_in, H, W = x_nchw.shape
    ncp = packed["cbias"].shape[1]
    tb = packed["s1"].shape[1] // (H // 2)     # images per grid step (from pack)
    grid = -(-B // tb)
    b_pad = grid * tb

    # NCHW -> NHWC -> [b, H, W*Cin]; zero-pad batch + conv rows on the host and
    # K-stack the three dh-shifted planes -> [b_pad*H, 3*W*Cin] bf16.
    x2 = jnp.transpose(x_nchw, (0, 2, 3, 1)).reshape(B, H, W * c_in)
    x2 = jnp.pad(x2.astype(jnp.float32), ((0, b_pad - B), (1, 1), (0, 0)))
    xbig = jnp.concatenate([x2[:, dh:dh + H, :] for dh in range(3)], axis=-1)
    xbig = xbig.reshape(b_pad * H, 3 * W * c_in).astype(jnp.bfloat16)

    def _full(a):
        rank = a.ndim
        return pl.BlockSpec(a.shape, lambda *_: (0,) * rank)

    out = pl.pallas_call(
        _fspredictor_kernel,
        out_shape=jax.ShapeDtypeStruct((b_pad, ncp), jnp.float32),
        grid=(grid,),
        in_specs=[
            pl.BlockSpec((tb * H, 3 * W * c_in), lambda g: (g, 0)),
            _full(packed["w1band"]), _full(packed["b1"]),
            _full(packed["s1"]), _full(packed["t1"]), _full(packed["sh1"]),
            _full(packed["w2band"]), _full(packed["b2"]),
            _full(packed["s2"]), _full(packed["t2"]),
            _full(packed["mn"]), _full(packed["cbias"]),
        ],
        out_specs=pl.BlockSpec((tb, ncp), lambda g: (g, 0)),
        compiler_params=pltpu.CompilerParams(
            dimension_semantics=("parallel",)),
    )(xbig, packed["w1band"], packed["b1"], packed["s1"], packed["t1"],
      packed["sh1"], packed["w2band"], packed["b2"], packed["s2"],
      packed["t2"], packed["mn"], packed["cbias"])
    return out[:B]


# ----------------------------------------------------------------------------
# Plain-JAX reference (used for __init__ prototype building and for checking)
# ----------------------------------------------------------------------------
def _conv3x3_same_ref(x_nhwc, w_hwio, b):
    B, H, W, C = x_nhwc.shape
    xp = jnp.pad(x_nhwc, ((0, 0), (1, 1), (1, 1), (0, 0)))
    out = jnp.zeros((B, H, W, w_hwio.shape[3]), jnp.float32)
    for kh in range(3):
        for kw in range(3):
            out = out + jnp.einsum("bhwc,cd->bhwd",
                                   xp[:, kh:kh + H, kw:kw + W, :], w_hwio[kh, kw])
    return out + b


def _maxpool2_ref(x_nhwc):
    B, H, W, C = x_nhwc.shape
    return x_nhwc.reshape(B, H // 2, 2, W // 2, 2, C).max(axis=(2, 4))


def emb_net_ref(x_nchw, w1, b1, w2, b2):
    x = jnp.transpose(x_nchw, (0, 2, 3, 1)).astype(jnp.float32)
    x = _maxpool2_ref(jnp.maximum(_conv3x3_same_ref(x, w1, b1), 0.0))
    x = _maxpool2_ref(jnp.maximum(_conv3x3_same_ref(x, w2, b2), 0.0))
    return x.reshape(x.shape[0], -1)                      # NHWC flatten


def fspredictor_forward_ref(x_nchw, w1, b1, w2, b2, mat, bias):
    e = emb_net_ref(x_nchw, w1, b1, w2, b2)
    nm = mat / jnp.linalg.norm(mat, axis=1, keepdims=True)
    return e @ nm.T + bias


# ----------------------------------------------------------------------------
# Main: deterministic synthetic params / support set / input
# ----------------------------------------------------------------------------
if __name__ == "__main__":
    B, C_IN, H, W = 2, 4, 16, 16
    C1, C2 = 8, 16
    N_CLASSES, N_SUPPORT = 5, 4
    TB = 8                                                # images per grid step
    EMB_DIM = C2 * (H // 4) * (W // 4)                    # 16 * 4 * 4 = 256

    key = jax.random.PRNGKey(0)
    k_w1, k_w2, k_sup, k_x = jax.random.split(key, 4)

    w1 = 0.1 * jax.random.normal(k_w1, (3, 3, C_IN, C1), jnp.float32)
    b1 = jnp.zeros((C1,), jnp.float32)
    w2 = 0.1 * jax.random.normal(k_w2, (3, 3, C1, C2), jnp.float32)
    b2 = jnp.zeros((C2,), jnp.float32)

    # __init__: prototype matrix = per-class mean embedding of the support set.
    support = jax.random.normal(k_sup, (N_CLASSES, N_SUPPORT, C_IN, H, W), jnp.float32)
    sup_embs = emb_net_ref(support.reshape(N_CLASSES * N_SUPPORT, C_IN, H, W),
                           w1, b1, w2, b2)
    mat = sup_embs.reshape(N_CLASSES, N_SUPPORT, EMB_DIM).mean(axis=1)
    bias = jnp.zeros((N_CLASSES,), jnp.float32)
    assert mat.shape == (N_CLASSES, EMB_DIM)

    packed = pack_params(w1, b1, w2, b2, mat, bias, H, W, tb=TB)

    # Query input (NCHW, matching the PyTorch forward signature).
    x = jax.random.normal(k_x, (B, C_IN, H, W), jnp.float32)

    fwd = jax.jit(fspredictor_forward)
    out_pad = jax.block_until_ready(fwd(x, packed))       # [B, 128] (class-padded)
    out = out_pad[:, :N_CLASSES]
    assert out.shape == (B, N_CLASSES) and out.dtype == jnp.float32

    # Correctness check vs. the plain-JAX reference (conv weights rounded to
    # bf16 to mirror the kernel's matmul-operand precision).
    w1_q = w1.astype(jnp.bfloat16).astype(jnp.float32)
    w2_q = w2.astype(jnp.bfloat16).astype(jnp.float32)
    ref = fspredictor_forward_ref(x, w1_q, b1, w2_q, b2, mat, bias)
    assert jnp.allclose(out, ref, rtol=5e-2, atol=5e-2)

    print("KERNEL_OK")
</pallas_src>

<mosaic_0001>
module attributes {stable_mosaic.version = 11 : i64} {
  func.func @_fspredictor_kernel(%arg0: i32, %arg1: memref<128x192xbf16, #tpu.memory_space<vmem>>, %arg2: memref<192x128xbf16, #tpu.memory_space<vmem>>, %arg3: memref<1x128xf32, #tpu.memory_space<vmem>>, %arg4: memref<2x64x128xbf16, #tpu.memory_space<vmem>>, %arg5: memref<2x128x64xbf16, #tpu.memory_space<vmem>>, %arg6: memref<3x64x64xbf16, #tpu.memory_space<vmem>>, %arg7: memref<3x64x128xbf16, #tpu.memory_space<vmem>>, %arg8: memref<1x128xf32, #tpu.memory_space<vmem>>, %arg9: memref<2x32x64xbf16, #tpu.memory_space<vmem>>, %arg10: memref<2x128x64xbf16, #tpu.memory_space<vmem>>, %arg11: memref<4x64x128xf32, #tpu.memory_space<vmem>>, %arg12: memref<1x128xf32, #tpu.memory_space<vmem>>, %arg13: memref<8x128xf32, #tpu.memory_space<vmem>>) attributes {dimension_semantics = [#tpu.dimension_semantics<parallel>], iteration_bounds = array<i64: 1>, scalar_prefetch = 0 : i64, scratch_operands = 0 : i64, tpu.core_type = #tpu.core_type<tc>, window_params = [{transform_indices = @transform_0, window_bounds = array<i64: 128, 192>}, {pipeline_mode = #tpu.pipeline_mode<synchronous>, transform_indices = @transform_1, window_bounds = array<i64: 192, 128>}, {pipeline_mode = #tpu.pipeline_mode<synchronous>, transform_indices = @transform_2, window_bounds = array<i64: 1, 128>}, {pipeline_mode = #tpu.pipeline_mode<synchronous>, transform_indices = @transform_3, window_bounds = array<i64: 2, 64, 128>}, {pipeline_mode = #tpu.pipeline_mode<synchronous>, transform_indices = @transform_4, window_bounds = array<i64: 2, 128, 64>}, {pipeline_mode = #tpu.pipeline_mode<synchronous>, transform_indices = @transform_5, window_bounds = array<i64: 3, 64, 64>}, {pipeline_mode = #tpu.pipeline_mode<synchronous>, transform_indices = @transform_6, window_bounds = array<i64: 3, 64, 128>}, {pipeline_mode = #tpu.pipeline_mode<synchronous>, transform_indices = @transform_7, window_bounds = array<i64: 1, 128>}, {pipeline_mode = #tpu.pipeline_mode<synchronous>, transform_indices = @transform_8, window_bounds = array<i64: 2, 32, 64>}, {pipeline_mode = #tpu.pipeline_mode<synchronous>, transform_indices = @transform_9, window_bounds = array<i64: 2, 128, 64>}, {pipeline_mode = #tpu.pipeline_mode<synchronous>, transform_indices = @transform_10, window_bounds = array<i64: 4, 64, 128>}, {pipeline_mode = #tpu.pipeline_mode<synchronous>, transform_indices = @transform_11, window_bounds = array<i64: 1, 128>}, {transform_indices = @transform_12, window_bounds = array<i64: 8, 128>}]} {
    %c0 = arith.constant 0 : index
    %c0_0 = arith.constant 0 : index
    %0 = vector.load %arg1[%c0, %c0_0] : memref<128x192xbf16, #tpu.memory_space<vmem>>, vector<128x192xbf16>
    %c0_1 = arith.constant 0 : index
    %c0_2 = arith.constant 0 : index
    %1 = vector.load %arg2[%c0_1, %c0_2] : memref<192x128xbf16, #tpu.memory_space<vmem>>, vector<192x128xbf16>
    %cst = arith.constant dense<0.000000e+00> : vector<128x128xf32>
    %2 = tpu.matmul %0, %1, %cst {dimension_numbers = #tpu.dot_dimension_numbers<[1], [0], [0], [1], [0, 0, 1, 1], [], []>} : vector<128x192xbf16>, vector<192x128xbf16>, vector<128x128xf32> -> vector<128x128xf32>
    %c0_3 = arith.constant 0 : index
    %c0_4 = arith.constant 0 : index
    %3 = vector.load %arg3[%c0_3, %c0_4] : memref<1x128xf32, #tpu.memory_space<vmem>>, vector<1x128xf32>
    %4 = vector.broadcast %3 : vector<1x128xf32> to vector<128x128xf32>
    %5 = arith.addf %2, %4 : vector<128x128xf32>
    %cst_5 = arith.constant 0.000000e+00 : f32
    %6 = vector.broadcast %cst_5 : f32 to vector<128x128xf32>
    %7 = arith.maximumf %5, %6 : vector<128x128xf32>
    %8 = arith.truncf %7 : vector<128x128xf32> to vector<128x128xbf16>
    %c0_6 = arith.constant 0 : index
    %c0_7 = arith.constant 0 : index
    %c0_8 = arith.constant 0 : index
    %9 = vector.load %arg4[%c0_6, %c0_7, %c0_8] : memref<2x64x128xbf16, #tpu.memory_space<vmem>>, vector<1x64x128xbf16>
    %10 = vector.shape_cast %9 : vector<1x64x128xbf16> to vector<64x128xbf16>
    %cst_9 = arith.constant dense<0.000000e+00> : vector<64x128xf32>
    %11 = tpu.matmul %10, %8, %cst_9 {dimension_numbers = #tpu.dot_dimension_numbers<[1], [0], [0], [1], [0, 0, 1, 1], [], []>} : vector<64x128xbf16>, vector<128x128xbf16>, vector<64x128xf32> -> vector<64x128xf32>
    %c1 = arith.constant 1 : index
    %c0_10 = arith.constant 0 : index
    %c0_11 = arith.constant 0 : index
    %12 = vector.load %arg4[%c1, %c0_10, %c0_11] : memref<2x64x128xbf16, #tpu.memory_space<vmem>>, vector<1x64x128xbf16>
    %13 = vector.shape_cast %12 : vector<1x64x128xbf16> to vector<64x128xbf16>
    %cst_12 = arith.constant dense<0.000000e+00> : vector<64x128xf32>
    %14 = tpu.matmul %13, %8, %cst_12 {dimension_numbers = #tpu.dot_dimension_numbers<[1], [0], [0], [1], [0, 0, 1, 1], [], []>} : vector<64x128xbf16>, vector<128x128xbf16>, vector<64x128xf32> -> vector<64x128xf32>
    %15 = arith.maximumf %11, %14 : vector<64x128xf32>
    %16 = arith.truncf %15 : vector<64x128xf32> to vector<64x128xbf16>
    %c0_13 = arith.constant 0 : index
    %c0_14 = arith.constant 0 : index
    %c0_15 = arith.constant 0 : index
    %17 = vector.load %arg5[%c0_13, %c0_14, %c0_15] : memref<2x128x64xbf16, #tpu.memory_space<vmem>>, vector<1x128x64xbf16>
    %18 = vector.shape_cast %17 : vector<1x128x64xbf16> to vector<128x64xbf16>
    %cst_16 = arith.constant dense<0.000000e+00> : vector<64x64xf32>
    %19 = tpu.matmul %16, %18, %cst_16 {dimension_numbers = #tpu.dot_dimension_numbers<[1], [0], [0], [1], [0, 0, 1, 1], [], []>} : vector<64x128xbf16>, vector<128x64xbf16>, vector<64x64xf32> -> vector<64x64xf32>
    %c1_17 = arith.constant 1 : index
    %c0_18 = arith.constant 0 : index
    %c0_19 = arith.constant 0 : index
    %20 = vector.load %arg5[%c1_17, %c0_18, %c0_19] : memref<2x128x64xbf16, #tpu.memory_space<vmem>>, vector<1x128x64xbf16>
    %21 = vector.shape_cast %20 : vector<1x128x64xbf16> to vector<128x64xbf16>
    %cst_20 = arith.constant dense<0.000000e+00> : vector<64x64xf32>
    %22 = tpu.matmul %16, %21, %cst_20 {dimension_numbers = #tpu.dot_dimension_numbers<[1], [0], [0], [1], [0, 0, 1, 1], [], []>} : vector<64x128xbf16>, vector<128x64xbf16>, vector<64x64xf32> -> vector<64x64xf32>
    %23 = arith.maximumf %19, %22 : vector<64x64xf32>
    %24 = arith.truncf %23 : vector<64x64xf32> to vector<64x64xbf16>
    %c0_21 = arith.constant 0 : index
    %c0_22 = arith.constant 0 : index
    %c0_23 = arith.constant 0 : index
    %25 = vector.load %arg6[%c0_21, %c0_22, %c0_23] : memref<3x64x64xbf16, #tpu.memory_space<vmem>>, vector<1x64x64xbf16>
    %26 = vector.shape_cast %25 : vector<1x64x64xbf16> to vector<64x64xbf16>
    %cst_24 = arith.constant dense<0.000000e+00> : vector<64x64xf32>
    %27 = tpu.matmul %26, %24, %cst_24 {dimension_numbers = #tpu.dot_dimension_numbers<[1], [0], [0], [1], [0, 0, 1, 1], [], []>} : vector<64x64xbf16>, vector<64x64xbf16>, vector<64x64xf32> -> vector<64x64xf32>
    %28 = arith.truncf %27 : vector<64x64xf32> to vector<64x64xbf16>
    %c0_25 = arith.constant 0 : index
    %c0_26 = arith.constant 0 : index
    %c0_27 = arith.constant 0 : index
    %29 = vector.load %arg7[%c0_25, %c0_26, %c0_27] : memref<3x64x128xbf16, #tpu.memory_space<vmem>>, vector<1x64x128xbf16>
    %30 = vector.shape_cast %29 : vector<1x64x128xbf16> to vector<64x128xbf16>
    %cst_28 = arith.constant dense<0.000000e+00> : vector<64x128xf32>
    %31 = tpu.matmul %28, %30, %cst_28 {dimension_numbers = #tpu.dot_dimension_numbers<[1], [0], [0], [1], [0, 0, 1, 1], [], []>} : vector<64x64xbf16>, vector<64x128xbf16>, vector<64x128xf32> -> vector<64x128xf32>
    %c1_29 = arith.constant 1 : index
    %c0_30 = arith.constant 0 : index
    %c0_31 = arith.constant 0 : index
    %32 = vector.load %arg6[%c1_29, %c0_30, %c0_31] : memref<3x64x64xbf16, #tpu.memory_space<vmem>>, vector<1x64x64xbf16>
    %33 = vector.shape_cast %32 : vector<1x64x64xbf16> to vector<64x64xbf16>
    %cst_32 = arith.constant dense<0.000000e+00> : vector<64x64xf32>
    %34 = tpu.matmul %33, %24, %cst_32 {dimension_numbers = #tpu.dot_dimension_numbers<[1], [0], [0], [1], [0, 0, 1, 1], [], []>} : vector<64x64xbf16>, vector<64x64xbf16>, vector<64x64xf32> -> vector<64x64xf32>
    %35 = arith.truncf %34 : vector<64x64xf32> to vector<64x64xbf16>
    %c1_33 = arith.constant 1 : index
    %c0_34 = arith.constant 0 : index
    %c0_35 = arith.constant 0 : index
    %36 = vector.load %arg7[%c1_33, %c0_34, %c0_35] : memref<3x64x128xbf16, #tpu.memory_space<vmem>>, vector<1x64x128xbf16>
    %37 = vector.shape_cast %36 : vector<1x64x128xbf16> to vector<64x128xbf16>
    %cst_36 = arith.constant dense<0.000000e+00> : vector<64x128xf32>
    %38 = tpu.matmul %35, %37, %cst_36 {dimension_numbers = #tpu.dot_dimension_numbers<[1], [0], [0], [1], [0, 0, 1, 1], [], []>} : vector<64x64xbf16>, vector<64x128xbf16>, vector<64x128xf32> -> vector<64x128xf32>
    %39 = arith.addf %31, %38 : vector<64x128xf32>
    %c2 = arith.constant 2 : index
    %c0_37 = arith.constant 0 : index
    %c0_38 = arith.constant 0 : index
    %40 = vector.load %arg6[%c2, %c0_37, %c0_38] : memref<3x64x64xbf16, #tpu.memory_space<vmem>>, vector<1x64x64xbf16>
    %41 = vector.shape_cast %40 : vector<1x64x64xbf16> to vector<64x64xbf16>
    %cst_39 = arith.constant dense<0.000000e+00> : vector<64x64xf32>
    %42 = tpu.matmul %41, %24, %cst_39 {dimension_numbers = #tpu.dot_dimension_numbers<[1], [0], [0], [1], [0, 0, 1, 1], [], []>} : vector<64x64xbf16>, vector<64x64xbf16>, vector<64x64xf32> -> vector<64x64xf32>
    %43 = arith.truncf %42 : vector<64x64xf32> to vector<64x64xbf16>
    %c2_40 = arith.constant 2 : index
    %c0_41 = arith.constant 0 : index
    %c0_42 = arith.constant 0 : index
    %44 = vector.load %arg7[%c2_40, %c0_41, %c0_42] : memref<3x64x128xbf16, #tpu.memory_space<vmem>>, vector<1x64x128xbf16>
    %45 = vector.shape_cast %44 : vector<1x64x128xbf16> to vector<64x128xbf16>
    %cst_43 = arith.constant dense<0.000000e+00> : vector<64x128xf32>
    %46 = tpu.matmul %43, %45, %cst_43 {dimension_numbers = #tpu.dot_dimension_numbers<[1], [0], [0], [1], [0, 0, 1, 1], [], []>} : vector<64x64xbf16>, vector<64x128xbf16>, vector<64x128xf32> -> vector<64x128xf32>
    %47 = arith.addf %39, %46 : vector<64x128xf32>
    %c0_44 = arith.constant 0 : index
    %c0_45 = arith.constant 0 : index
    %48 = vector.load %arg8[%c0_44, %c0_45] : memref<1x128xf32, #tpu.memory_space<vmem>>, vector<1x128xf32>
    %49 = vector.broadcast %48 : vector<1x128xf32> to vector<64x128xf32>
    %50 = arith.addf %47, %49 : vector<64x128xf32>
    %cst_46 = arith.constant 0.000000e+00 : f32
    %51 = vector.broadcast %cst_46 : f32 to vector<64x128xf32>
    %52 = arith.maximumf %50, %51 : vector<64x128xf32>
    %53 = arith.truncf %52 : vector<64x128xf32> to vector<64x128xbf16>
    %c0_47 = arith.constant 0 : index
    %c0_48 = arith.constant 0 : index
    %c0_49 = arith.constant 0 : index
    %54 = vector.load %arg9[%c0_47, %c0_48, %c0_49] : memref<2x32x64xbf16, #tpu.memory_space<vmem>>, vector<1x32x64xbf16>
    %55 = vector.shape_cast %54 : vector<1x32x64xbf16> to vector<32x64xbf16>
    %cst_50 = arith.constant dense<0.000000e+00> : vector<32x128xf32>
    %56 = tpu.matmul %55, %53, %cst_50 {dimension_numbers = #tpu.dot_dimension_numbers<[1], [0], [0], [1], [0, 0, 1, 1], [], []>} : vector<32x64xbf16>, vector<64x128xbf16>, vector<32x128xf32> -> vector<32x128xf32>
    %c1_51 = arith.constant 1 : index
    %c0_52 = arith.constant 0 : index
    %c0_53 = arith.constant 0 : index
    %57 = vector.load %arg9[%c1_51, %c0_52, %c0_53] : memref<2x32x64xbf16, #tpu.memory_space<vmem>>, vector<1x32x64xbf16>
    %58 = vector.shape_cast %57 : vector<1x32x64xbf16> to vector<32x64xbf16>
    %cst_54 = arith.constant dense<0.000000e+00> : vector<32x128xf32>
    %59 = tpu.matmul %58, %53, %cst_54 {dimension_numbers = #tpu.dot_dimension_numbers<[1], [0], [0], [1], [0, 0, 1, 1], [], []>} : vector<32x64xbf16>, vector<64x128xbf16>, vector<32x128xf32> -> vector<32x128xf32>
    %60 = arith.maximumf %56, %59 : vector<32x128xf32>
    %61 = arith.truncf %60 : vector<32x128xf32> to vector<32x128xbf16>
    %c0_55 = arith.constant 0 : index
    %c0_56 = arith.constant 0 : index
    %c0_57 = arith.constant 0 : index
    %62 = vector.load %arg10[%c0_55, %c0_56, %c0_57] : memref<2x128x64xbf16, #tpu.memory_space<vmem>>, vector<1x128x64xbf16>
    %63 = vector.shape_cast %62 : vector<1x128x64xbf16> to vector<128x64xbf16>
    %cst_58 = arith.constant dense<0.000000e+00> : vector<32x64xf32>
    %64 = tpu.matmul %61, %63, %cst_58 {dimension_numbers = #tpu.dot_dimension_numbers<[1], [0], [0], [1], [0, 0, 1, 1], [], []>} : vector<32x128xbf16>, vector<128x64xbf16>, vector<32x64xf32> -> vector<32x64xf32>
    %c1_59 = arith.constant 1 : index
    %c0_60 = arith.constant 0 : index
    %c0_61 = arith.constant 0 : index
    %65 = vector.load %arg10[%c1_59, %c0_60, %c0_61] : memref<2x128x64xbf16, #tpu.memory_space<vmem>>, vector<1x128x64xbf16>
    %66 = vector.shape_cast %65 : vector<1x128x64xbf16> to vector<128x64xbf16>
    %cst_62 = arith.constant dense<0.000000e+00> : vector<32x64xf32>
    %67 = tpu.matmul %61, %66, %cst_62 {dimension_numbers = #tpu.dot_dimension_numbers<[1], [0], [0], [1], [0, 0, 1, 1], [], []>} : vector<32x128xbf16>, vector<128x64xbf16>, vector<32x64xf32> -> vector<32x64xf32>
    %68 = arith.maximumf %64, %67 : vector<32x64xf32>
    %c0_63 = arith.constant 0 : index
    %c0_64 = arith.constant 0 : index
    %69 = vector.load %arg12[%c0_63, %c0_64] : memref<1x128xf32, #tpu.memory_space<vmem>>, vector<1x128xf32>
    %70 = vector.extract_strided_slice %68 {offsets = [0, 0], sizes = [8, 64], strides = [1, 1]} : vector<32x64xf32> to vector<8x64xf32>
    %c0_65 = arith.constant 0 : index
    %c0_66 = arith.constant 0 : index
    %c0_67 = arith.constant 0 : index
    %71 = vector.load %arg11[%c0_65, %c0_66, %c0_67] : memref<4x64x128xf32, #tpu.memory_space<vmem>>, vector<1x64x128xf32>
    %72 = vector.shape_cast %71 : vector<1x64x128xf32> to vector<64x128xf32>
    %cst_68 = arith.constant dense<0.000000e+00> : vector<8x128xf32>
    %73 = tpu.matmul %70, %72, %cst_68 {dimension_numbers = #tpu.dot_dimension_numbers<[1], [0], [0], [1], [0, 0, 1, 1], [], []>} : vector<8x64xf32>, vector<64x128xf32>, vector<8x128xf32> -> vector<8x128xf32>
    %74 = vector.broadcast %69 : vector<1x128xf32> to vector<8x128xf32>
    %75 = arith.addf %74, %73 : vector<8x128xf32>
    %76 = vector.extract_strided_slice %68 {offsets = [8, 0], sizes = [8, 64], strides = [1, 1]} : vector<32x64xf32> to vector<8x64xf32>
    %c1_69 = arith.constant 1 : index
    %c0_70 = arith.constant 0 : index
    %c0_71 = arith.constant 0 : index
    %77 = vector.load %arg11[%c1_69, %c0_70, %c0_71] : memref<4x64x128xf32, #tpu.memory_space<vmem>>, vector<1x64x128xf32>
    %78 = vector.shape_cast %77 : vector<1x64x128xf32> to vector<64x128xf32>
    %cst_72 = arith.constant dense<0.000000e+00> : vector<8x128xf32>
    %79 = tpu.matmul %76, %78, %cst_72 {dimension_numbers = #tpu.dot_dimension_numbers<[1], [0], [0], [1], [0, 0, 1, 1], [], []>} : vector<8x64xf32>, vector<64x128xf32>, vector<8x128xf32> -> vector<8x128xf32>
    %80 = arith.addf %75, %79 : vector<8x128xf32>
    %81 = vector.extract_strided_slice %68 {offsets = [16, 0], sizes = [8, 64], strides = [1, 1]} : vector<32x64xf32> to vector<8x64xf32>
    %c2_73 = arith.constant 2 : index
    %c0_74 = arith.constant 0 : index
    %c0_75 = arith.constant 0 : index
    %82 = vector.load %arg11[%c2_73, %c0_74, %c0_75] : memref<4x64x128xf32, #tpu.memory_space<vmem>>, vector<1x64x128xf32>
    %83 = vector.shape_cast %82 : vector<1x64x128xf32> to vector<64x128xf32>
    %cst_76 = arith.constant dense<0.000000e+00> : vector<8x128xf32>
    %84 = tpu.matmul %81, %83, %cst_76 {dimension_numbers = #tpu.dot_dimension_numbers<[1], [0], [0], [1], [0, 0, 1, 1], [], []>} : vector<8x64xf32>, vector<64x128xf32>, vector<8x128xf32> -> vector<8x128xf32>
    %85 = arith.addf %80, %84 : vector<8x128xf32>
    %86 = vector.extract_strided_slice %68 {offsets = [24, 0], sizes = [8, 64], strides = [1, 1]} : vector<32x64xf32> to vector<8x64xf32>
    %c3 = arith.constant 3 : index
    %c0_77 = arith.constant 0 : index
    %c0_78 = arith.constant 0 : index
    %87 = vector.load %arg11[%c3, %c0_77, %c0_78] : memref<4x64x128xf32, #tpu.memory_space<vmem>>, vector<1x64x128xf32>
    %88 = vector.shape_cast %87 : vector<1x64x128xf32> to vector<64x128xf32>
    %cst_79 = arith.constant dense<0.000000e+00> : vector<8x128xf32>
    %89 = tpu.matmul %86, %88, %cst_79 {dimension_numbers = #tpu.dot_dimension_numbers<[1], [0], [0], [1], [0, 0, 1, 1], [], []>} : vector<8x64xf32>, vector<64x128xf32>, vector<8x128xf32> -> vector<8x128xf32>
    %90 = arith.addf %85, %89 : vector<8x128xf32>
    %c0_80 = arith.constant 0 : index
    %c0_81 = arith.constant 0 : index
    %91 = vector.load %arg13[%c0_80, %c0_81] : memref<8x128xf32, #tpu.memory_space<vmem>>, vector<8x128xf32>
    tpu.vector_store %arg13[%c0_80, %c0_81], %90 {strides = array<i32>} : memref<8x128xf32, #tpu.memory_space<vmem>>, vector<8x128xf32>,
    return
  }
  func.func @transform_0(%arg0: i32) -> (i32, i32) {
    %c0_i32 = arith.constant 0 : i32
    %c0_i32_0 = arith.constant 0 : i32
    return %arg0, %c0_i32 : i32, i32
  }
  func.func @transform_1(%arg0: i32) -> (i32, i32) {
    %c0_i32 = arith.constant 0 : i32
    %c0_i32_0 = arith.constant 0 : i32
    %c0_i32_1 = arith.constant 0 : i32
    return %c0_i32, %c0_i32_0 : i32, i32
  }
  func.func @transform_2(%arg0: i32) -> (i32, i32) {
    %c0_i32 = arith.constant 0 : i32
    %c0_i32_0 = arith.constant 0 : i32
    %c0_i32_1 = arith.constant 0 : i32
    return %c0_i32, %c0_i32_0 : i32, i32
  }
  func.func @transform_3(%arg0: i32) -> (i32, i32, i32) {
    %c0_i32 = arith.constant 0 : i32
    %c0_i32_0 = arith.constant 0 : i32
    %c0_i32_1 = arith.constant 0 : i32
    %c0_i32_2 = arith.constant 0 : i32
    return %c0_i32, %c0_i32_0, %c0_i32_1 : i32, i32, i32
  }
  func.func @transform_4(%arg0: i32) -> (i32, i32, i32) {
    %c0_i32 = arith.constant 0 : i32
    %c0_i32_0 = arith.constant 0 : i32
    %c0_i32_1 = arith.constant 0 : i32
    %c0_i32_2 = arith.constant 0 : i32
    return %c0_i32, %c0_i32_0, %c0_i32_1 : i32, i32, i32
  }
  func.func @transform_5(%arg0: i32) -> (i32, i32, i32) {
    %c0_i32 = arith.constant 0 : i32
    %c0_i32_0 = arith.constant 0 : i32
    %c0_i32_1 = arith.constant 0 : i32
    %c0_i32_2 = arith.constant 0 : i32
    return %c0_i32, %c0_i32_0, %c0_i32_1 : i32, i32, i32
  }
  func.func @transform_6(%arg0: i32) -> (i32, i32, i32) {
    %c0_i32 = arith.constant 0 : i32
    %c0_i32_0 = arith.constant 0 : i32
    %c0_i32_1 = arith.constant 0 : i32
    %c0_i32_2 = arith.constant 0 : i32
    return %c0_i32, %c0_i32_0, %c0_i32_1 : i32, i32, i32
  }
  func.func @transform_7(%arg0: i32) -> (i32, i32) {
    %c0_i32 = arith.constant 0 : i32
    %c0_i32_0 = arith.constant 0 : i32
    %c0_i32_1 = arith.constant 0 : i32
    return %c0_i32, %c0_i32_0 : i32, i32
  }
  func.func @transform_8(%arg0: i32) -> (i32, i32, i32) {
    %c0_i32 = arith.constant 0 : i32
    %c0_i32_0 = arith.constant 0 : i32
    %c0_i32_1 = arith.constant 0 : i32
    %c0_i32_2 = arith.constant 0 : i32
    return %c0_i32, %c0_i32_0, %c0_i32_1 : i32, i32, i32
  }
  func.func @transform_9(%arg0: i32) -> (i32, i32, i32) {
    %c0_i32 = arith.constant 0 : i32
    %c0_i32_0 = arith.constant 0 : i32
    %c0_i32_1 = arith.constant 0 : i32
    %c0_i32_2 = arith.constant 0 : i32
    return %c0_i32, %c0_i32_0, %c0_i32_1 : i32, i32, i32
  }
  func.func @transform_10(%arg0: i32) -> (i32, i32, i32) {
    %c0_i32 = arith.constant 0 : i32
    %c0_i32_0 = arith.constant 0 : i32
    %c0_i32_1 = arith.constant 0 : i32
    %c0_i32_2 = arith.constant 0 : i32
    return %c0_i32, %c0_i32_0, %c0_i32_1 : i32, i32, i32
  }
  func.func @transform_11(%arg0: i32) -> (i32, i32) {
    %c0_i32 = arith.constant 0 : i32
    %c0_i32_0 = arith.constant 0 : i32
    %c0_i32_1 = arith.constant 0 : i32
    return %c0_i32, %c0_i32_0 : i32, i32
  }
  func.func @transform_12(%arg0: i32) -> (i32, i32) {
    %c0_i32 = arith.constant 0 : i32
    %c0_i32_0 = arith.constant 0 : i32
    return %arg0, %c0_i32 : i32, i32
  }
}

</mosaic_0001>

<bundles_post_ra>
// kernel: fspredictor_forward.1
= control target key start
LH: loop header
LB: loop body
LE: loop exit
PB: predicated region body
PF: predicated region fallthrough
CT: control target
= control target key end

     0   :  { %v3183_v0 = vmov 0   ;;  %vm233_vm0 = vcmask 523264   ;;  %vm3185_vm1 = vmmov 0   ;;  %s3757_s1 = inlined_call_operand.vmem [shape: bf16[192,128], index: 1, kind: input, shape index: {}]   ;;  %s3758_s0 = inlined_call_operand.vmem [shape: bf16[128,192], index: 0, kind: input, shape index: {}]   ;;  %s3759_s3 = inlined_call_operand.vmem [shape: bf16[2,64,128], index: 3, kind: input, shape index: {}]   ;;  %s3760_s4 = inlined_call_operand.vmem [shape: bf16[2,128,64], index: 4, kind: input, shape index: {}]   ;;  %s3761_s2 = inlined_call_operand.vmem [shape: f32[1,128], index: 2, kind: input, shape index: {}]   ;;  %s3762_s5 = inlined_call_operand.vmem [shape: bf16[3,64,64], index: 5, kind: input, shape index: {}]   ;;  %s3763_s6 = inlined_call_operand.vmem [shape: bf16[3,64,128], index: 6, kind: input, shape index: {}]   ;;  %s3764_s8 = inlined_call_operand.vmem [shape: bf16[2,32,64], index: 8, kind: input, shape index: {}]   ;;  %s3765_s9 = inlined_call_operand.vmem [shape: bf16[2,128,64], index: 9, kind: input, shape index: {}]   ;;  %s3766_s7 = inlined_call_operand.vmem [shape: f32[1,128], index: 7, kind: input, shape index: {}]   ;;  %s3767_s10 = inlined_call_operand.vmem [shape: f32[4,64,128], index: 10, kind: input, shape index: {}]   ;;  %s3768_s11 = inlined_call_operand.vmem [shape: f32[1,128], index: 11, kind: input, shape index: {}]   ;;  %s3769_s12 = inlined_call_operand.vmem [shape: f32[8,128], index: 12, kind: output, shape index: {}]  }
   0x1   :  { %258 = vmatprep.subr.bf16.mxu0 %v3183_v0  ;;  %v3079_v1 = vld [vmem:[%s3757_s1] sm:$0xff]   ;;  %v3080_v2 = vld [vmem:[%s3757_s1 + $0x8] sm:$0xff]   ;;  %v3081_v3 = vld [vmem:[%s3757_s1 + $0x10] sm:$0xff]  }
   0x2   :  { %259 = vmatpush1.bf16.msra.mxu0 %v3079_v1  ;;  %v3082_v4 = vld [vmem:[%s3757_s1 + $0x18] sm:$0xff]   ;;  %v3093_v5 = vld [vmem:[%s3758_s0 + $0x4] ss:$8 sps:$4 sm:$0xff]   ;;  %v3085_v8 = vld [vmem:[%s3757_s1 + $0x30] sm:$0xff]  }
   0x3   :  { %260 = vmatprep.subr.bf16.mxu0 %v3183_v0  ;;  %v3083_v6 = vld [vmem:[%s3757_s1 + $0x20] sm:$0xff]   ;;  %2298 = vmatprep.mubr.msk.bf16.mxu0 %vm233_vm0, %v3093_v5  ;;  %v3084_v7 = vld [vmem:[%s3757_s1 + $0x28] sm:$0xff]   ;;  %v3086_v9 = vld [vmem:[%s3757_s1 + $0x38] sm:$0xff]  }
   0x4   :  { %v3087_v10 = vld [vmem:[%s3757_s1 + $0x40] sm:$0xff]   ;;  %v3088_v11 = vld [vmem:[%s3757_s1 + $0x48] sm:$0xff]   ;;  %v3089_v12 = vld [vmem:[%s3757_s1 + $0x50] sm:$0xff]  }
   0x5   :  { %v3090_v13 = vld [vmem:[%s3757_s1 + $0x58] sm:$0xff]   ;;  %v3091_v14 = vld [vmem:[%s3758_s0] ss:$8 sps:$4 sm:$0xff]   ;;  %v3097_v17 = vld [vmem:[%s3758_s0 + $0x24] ss:$8 sps:$4 sm:$0xff]  }
   0x6   :  { %261 = vmatpush1.bf16.msra.mxu0 %v3080_v2  ;;  %v3094_v15 = vld [vmem:[%s3758_s0 + $0x14] ss:$8 sps:$4 sm:$0xff]   ;;  %v3096_v16 = vld [vmem:[%s3758_s0 + $0x10] ss:$8 sps:$4 sm:$0xff]   ;;  %v3099_v18 = vld [vmem:[%s3758_s0 + $0x20] ss:$8 sps:$4 sm:$0xff]  }
   0x7   :  { %262 = vmatprep.subr.bf16.mxu0 %v3183_v0  ;;  %v3100_v19 = vld [vmem:[%s3758_s0 + $0x34] ss:$8 sps:$4 sm:$0xff]   ;;  %v3102_v20 = vld [vmem:[%s3758_s0 + $0x30] ss:$8 sps:$4 sm:$0xff]   ;;  %v3103_v21 = vld [vmem:[%s3758_s0 + $0x44] ss:$8 sps:$4 sm:$0xff]  }
   0x8   :  { %v3105_v22 = vld [vmem:[%s3758_s0 + $0x40] ss:$8 sps:$4 sm:$0xff]   ;;  %v3106_v23 = vld [vmem:[%s3758_s0 + $0x54] ss:$8 sps:$4 sm:$0xff]   ;;  %v3108_v24 = vld [vmem:[%s3758_s0 + $0x50] ss:$8 sps:$4 sm:$0xff]  }
   0x9   :  { %v3109_v25 = vld [vmem:[%s3758_s0 + $0x64] ss:$8 sps:$4 sm:$0xff]   ;;  %v3111_v26 = vld [vmem:[%s3758_s0 + $0x60] ss:$8 sps:$4 sm:$0xff]   ;;  %v3112_v27 = vld [vmem:[%s3758_s0 + $0x74] ss:$8 sps:$4 sm:$0xff]  }
   0xa   :  { %263 = vmatpush1.bf16.msra.mxu0 %v3081_v3  ;;  %v3114_v28 = vld [vmem:[%s3758_s0 + $0x70] ss:$8 sps:$4 sm:$0xff]   ;;  %v3115_v29 = vld [vmem:[%s3759_s3] sm:$0xff]   ;;  %v3124_v31 = vld [vmem:[%s3760_s4 + $0x48] sm:$0xff]  }
   0xb   :  { %264 = vmatprep.subr.bf16.mxu0 %v3183_v0  ;;  %2688 = vmatprep.mubr.bf16.mxu1 %v3115_v29  ;;  %v3123_v30 = vld [vmem:[%s3760_s4 + $0x40] sm:$0xff]   ;;  %v3125_v32 = vld [vmem:[%s3760_s4 + $0x50] sm:$0xff]  }
   0xc   :  { %v3359_v33 = vld [vmem:[%s3761_s2] ss:$0 sm:$0xff] }
   0xe   :  { %265 = vmatpush1.bf16.msra.mxu0 %v3082_v4 }
   0xf   :  { %266 = vmatprep.subr.bf16.mxu0 %v3183_v0 }
  0x12   :  { %267 = vmatpush1.bf16.msra.mxu0 %v3083_v6 }
  0x13   :  { %268 = vmatprep.subr.bf16.mxu0 %v3183_v0 }
  0x16   :  { %269 = vmatpush1.bf16.msra.mxu0 %v3084_v7 }
  0x17   :  { %270 = vmatprep.subr.bf16.mxu0 %v3183_v0 }
  0x1a   :  { %271 = vmatpush1.bf16.msra.mxu0 %v3085_v8 }
  0x1b   :  { %272 = vmatprep.subr.bf16.mxu0 %v3183_v0 }
  0x1e   :  { %273 = vmatpush1.bf16.msra.mxu0 %v3086_v9 }
  0x1f   :  { %274 = vmatprep.subr.bf16.mxu0 %v3183_v0 }
  0x22   :  { %275 = vmatpush1.bf16.msra.mxu0 %v3087_v10 }
  0x23   :  { %276 = vmatprep.subr.bf16.mxu0 %v3183_v0 }
  0x26   :  { %277 = vmatpush1.bf16.msra.mxu0 %v3088_v11 }
  0x27   :  { %278 = vmatprep.subr.bf16.mxu0 %v3183_v0 }
  0x2a   :  { %279 = vmatpush1.bf16.msra.mxu0 %v3089_v12 }
  0x2b   :  { %280 = vmatprep.subr.bf16.mxu0 %v3183_v0 }
  0x2e   :  { %281 = vmatpush1.bf16.msra.mxu0 %v3090_v13 }
  0x2f   :  { %2744 = vmatprep.subr.bf16.mxu0 %v3123_v30 }
  0x31   :  { %291 = vmatmul.mubr.bf16.vlgmr.msra.gmra.mrb[0].mxu0 %v3091_v14 }
  0x32   :  { %2299 = vmatprep.mubr.msk.bf16.mxu0 %vm233_vm0, %v3094_v15  ;;  %2745 = vmatpush3.bf16.msra.mxu0 %v3123_v30 }
  0x33   :  { %2746 = vmatprep.subr.bf16.mxu0 %v3124_v31 }
  0x36   :  { %2747 = vmatpush3.bf16.msra.mxu0 %v3124_v31 }
  0x37   :  { %2748 = vmatprep.subr.bf16.mxu0 %v3125_v32 }
  0x39   :  { %299 = vmatmul.mubr.bf16.gmra.mrb[4].mxu0 %v3096_v16 }
  0x3a   :  { %2300 = vmatprep.mubr.msk.bf16.mxu0 %vm233_vm0, %v3097_v17  ;;  %2749 = vmatpush3.bf16.msra.mxu0 %v3125_v32 }
  0x41   :  { %307 = vmatmul.mubr.bf16.gmra.mrb[8].mxu0 %v3099_v18 }
  0x42   :  { %2301 = vmatprep.mubr.msk.bf16.mxu0 %vm233_vm0, %v3100_v19 }
  0x49   :  { %315 = vmatmul.mubr.bf16.gmra.mrb[12].mxu0 %v3102_v20 }
  0x4a   :  { %2302 = vmatprep.mubr.msk.bf16.mxu0 %vm233_vm0, %v3103_v21 }
  0x51   :  { %323 = vmatmul.mubr.bf16.gmra.mrb[16].mxu0 %v3105_v22 }
  0x52   :  { %2303 = vmatprep.mubr.msk.bf16.mxu0 %vm233_vm0, %v3106_v23 }
  0x59   :  { %331 = vmatmul.mubr.bf16.gmra.mrb[20].mxu0 %v3108_v24 }
  0x5a   :  { %2304 = vmatprep.mubr.msk.bf16.mxu0 %vm233_vm0, %v3109_v25 }
  0x61   :  { %339 = vmatmul.mubr.bf16.gmra.mrb[24].mxu0 %v3111_v26 }
  0x62   :  { %2305 = vmatprep.mubr.msk.bf16.mxu0 %vm233_vm0, %v3112_v27 }
  0x69   :  { %347 = vmatmul.mubr.bf16.gmra.mrb[28].mxu0 %v3114_v28 }
 0x104   :  { %v292_v34 = vpop.f32.mrb[0].mxu0 }
 0x105   :  { %v293_v35 = vadd.f32 %v3359_v33, %v292_v34  ;;  %v294_v36 = vpop.f32.mrb[1].mxu0 }
 0x106   :  { %v295_v37 = vpop.f32.mrb[2].mxu0 }
 0x107   :  { %v296_v38 = vadd.f32 %v3359_v33, %v295_v37  ;;  %v297_v39 = vpop.f32.mrb[3].mxu0  ;;  %v355_v40 = vmax.f32 %v293_v35, 0.0 }
 0x109   :  { %v356_v41 = vmax.f32 %v296_v38, 0.0 }
 0x10b   :  { %v3363_v42 = vpack.c.bf16 %v356_v41, %v355_v40 }
 0x10c   :  { %v300_v43 = vpop.f32.mrb[4].mxu0 }
 0x10d   :  { %v301_v44 = vadd.f32 %v3359_v33, %v300_v43  ;;  %v302_v45 = vpop.f32.mrb[5].mxu0  ;;  %2672 = vmatprep.subr.bf16.mxu1 %v3363_v42 }
 0x10e   :  { %v303_v46 = vpop.f32.mrb[6].mxu0  ;;  %2673 = vmatpush3.bf16.msra.mxu1 %v3363_v42  ;;  %v3117_v45 = vld [vmem:[%s3759_s3 + $0x10] sm:$0xff]  }
 0x10f   :  { %v304_v47 = vadd.f32 %v3359_v33, %v303_v46  ;;  %v305_v48 = vpop.f32.mrb[7].mxu0  ;;  %v357_v49 = vmax.f32 %v301_v44, 0.0  ;;  %v3116_v44 = vld [vmem:[%s3759_s3 + $0x8] sm:$0xff]   ;;  %v3119_v46 = vld [vmem:[%s3759_s3 + $0x20] sm:$0xff]  }
 0x110   :  { %v3122_v48 = vld [vmem:[%s3759_s3 + $0x38] sm:$0xff]  }
 0x111   :  { %v358_v50 = vmax.f32 %v304_v47, 0.0  ;;  %v3121_v47 = vld [vmem:[%s3759_s3 + $0x30] sm:$0xff]  }
 0x113   :  { %v3369_v51 = vpack.c.bf16 %v358_v50, %v357_v49  ;;  %v3126_v49 = vld [vmem:[%s3760_s4 + $0x58] sm:$0xff]   ;;  %v3127_v50 = vld [vmem:[%s3760_s4] sm:$0xff]  }
 0x114   :  { %v308_v52 = vpop.f32.mrb[8].mxu0  ;;  %2750 = vmatprep.subr.bf16.mxu0 %v3126_v49 }
 0x115   :  { %v309_v53 = vadd.f32 %v3359_v33, %v308_v52  ;;  %v310_v54 = vpop.f32.mrb[9].mxu0  ;;  %2674 = vmatprep.subr.bf16.mxu1 %v3369_v51  ;;  %v3129_v52 = vld [vmem:[%s3760_s4 + $0x8] sm:$0xff]   ;;  %2751 = vmatpush3.bf16.msra.mxu0 %v3126_v49 }
 0x116   :  { %v311_v55 = vpop.f32.mrb[10].mxu0  ;;  %2675 = vmatpush3.bf16.msra.mxu1 %v3369_v51  ;;  %v3130_v54 = vld [vmem:[%s3760_s4 + $0x10] sm:$0xff]  }
 0x117   :  { %v312_v56 = vadd.f32 %v3359_v33, %v311_v55  ;;  %v313_v57 = vpop.f32.mrb[11].mxu0  ;;  %v359_v58 = vmax.f32 %v309_v53, 0.0  ;;  %v3131_v53 = vld [vmem:[%s3760_s4 + $0x68] sm:$0xff]   ;;  %v3132_v55 = vld [vmem:[%s3760_s4 + $0x18] sm:$0xff]  }
 0x118   :  { %v3133_v57 = vld [vmem:[%s3760_s4 + $0x20] sm:$0xff]  }
 0x119   :  { %v360_v59 = vmax.f32 %v312_v56, 0.0  ;;  %v3134_v56 = vld [vmem:[%s3760_s4 + $0x70] sm:$0xff]  }
 0x11b   :  { %v3375_v60 = vpack.c.bf16 %v360_v59, %v359_v58  ;;  %v3135_v58 = vld [vmem:[%s3760_s4 + $0x28] sm:$0xff]   ;;  %v3136_v59 = vld [vmem:[%s3760_s4 + $0x30] sm:$0xff]  }
 0x11c   :  { %v316_v61 = vpop.f32.mrb[12].mxu0 }
 0x11d   :  { %v317_v62 = vadd.f32 %v3359_v33, %v316_v61  ;;  %v318_v63 = vpop.f32.mrb[13].mxu0  ;;  %2676 = vmatprep.subr.bf16.mxu1 %v3375_v60  ;;  %v3138_v61 = vld [vmem:[%s3760_s4 + $0x38] sm:$0xff]  }
 0x11e   :  { %v319_v0 = vpop.f32.mrb[14].mxu0  ;;  %2677 = vmatpush3.bf16.msra.mxu1 %v3375_v60 }
 0x11f   :  { %v320_v1 = vadd.f32 %v3359_v33, %v319_v0  ;;  %v321_v2 = vpop.f32.mrb[15].mxu0  ;;  %v361_v3 = vmax.f32 %v317_v62, 0.0 }
 0x121   :  { %v362_v4 = vmax.f32 %v320_v1, 0.0 }
 0x123   :  { %v374_v5 = vpack.c.bf16 %v362_v4, %v361_v3 }
 0x124   :  { %v324_v6 = vpop.f32.mrb[16].mxu0 }
 0x125   :  { %v325_v7 = vadd.f32 %v3359_v33, %v324_v6  ;;  %v326_v8 = vpop.f32.mrb[17].mxu0  ;;  %2678 = vmatprep.subr.bf16.mxu1 %v374_v5 }
 0x126   :  { %v327_v9 = vpop.f32.mrb[18].mxu0  ;;  %2679 = vmatpush3.bf16.msra.mxu1 %v374_v5 }
 0x127   :  { %v328_v10 = vadd.f32 %v3359_v33, %v327_v9  ;;  %v329_v11 = vpop.f32.mrb[19].mxu0  ;;  %v363_v12 = vmax.f32 %v325_v7, 0.0 }
 0x129   :  { %v364_v13 = vmax.f32 %v328_v10, 0.0 }
 0x12b   :  { %v375_v14 = vpack.c.bf16 %v364_v13, %v363_v12 }
 0x12c   :  { %v332_v15 = vpop.f32.mrb[20].mxu0 }
 0x12d   :  { %v333_v16 = vadd.f32 %v3359_v33, %v332_v15  ;;  %v334_v17 = vpop.f32.mrb[21].mxu0  ;;  %2680 = vmatprep.subr.bf16.mxu1 %v375_v14 }
 0x12e   :  { %v335_v18 = vpop.f32.mrb[22].mxu0  ;;  %2681 = vmatpush3.bf16.msra.mxu1 %v375_v14 }
 0x12f   :  { %v336_v19 = vadd.f32 %v3359_v33, %v335_v18  ;;  %v337_v20 = vpop.f32.mrb[23].mxu0  ;;  %v365_v21 = vmax.f32 %v333_v16, 0.0 }
 0x131   :  { %v366_v22 = vmax.f32 %v336_v19, 0.0 }
 0x133   :  { %v376_v23 = vpack.c.bf16 %v366_v22, %v365_v21 }
 0x134   :  { %v340_v24 = vpop.f32.mrb[24].mxu0 }
 0x135   :  { %v341_v25 = vadd.f32 %v3359_v33, %v340_v24  ;;  %v342_v26 = vpop.f32.mrb[25].mxu0  ;;  %2682 = vmatprep.subr.bf16.mxu1 %v376_v23 }
 0x136   :  { %v343_v27 = vpop.f32.mrb[26].mxu0  ;;  %2683 = vmatpush3.bf16.msra.mxu1 %v376_v23  ;;  %v3139_v26 = vld [vmem:[%s3762_s5] sm:$0xff]  }
 0x137   :  { %v344_v28 = vadd.f32 %v3359_v33, %v343_v27  ;;  %v345_v29 = vpop.f32.mrb[27].mxu0  ;;  %v367_v30 = vmax.f32 %v341_v25, 0.0 }
 0x139   :  { %v368_v31 = vmax.f32 %v344_v28, 0.0 }
 0x13b   :  { %v377_v32 = vpack.c.bf16 %v368_v31, %v367_v30 }
 0x13c   :  { %v348_v34 = vpop.f32.mrb[28].mxu0 }
 0x13d   :  { %v349_v35 = vadd.f32 %v3359_v33, %v348_v34  ;;  %v350_v36 = vpop.f32.mrb[29].mxu0  ;;  %2684 = vmatprep.subr.bf16.mxu1 %v377_v32 }
 0x13e   :  { %v351_v37 = vpop.f32.mrb[30].mxu0  ;;  %2685 = vmatpush3.bf16.msra.mxu1 %v377_v32 }
 0x13f   :  { %v352_v38 = vadd.f32 %v3359_v33, %v351_v37  ;;  %v353_v39 = vpop.f32.mrb[31].mxu0  ;;  %v369_v40 = vmax.f32 %v349_v35, 0.0  ;;  %v3118_v33 = vld [vmem:[%s3759_s3 + $0x18] sm:$0xff]  }
 0x141   :  { %v370_v41 = vmax.f32 %v352_v38, 0.0 }
 0x143   :  { %v378_v43 = vpack.c.bf16 %v370_v41, %v369_v40 }
 0x145   :  { %2686 = vmatprep.subr.bf16.mxu1 %v378_v43 }
 0x146   :  { %2687 = vmatpush3.bf16.msra.mxu1 %v378_v43 }
 0x147   :  { %2696 = vmatprep.subr.bf16.mxu1 %v3363_v42 }
 0x149   :  { %2689 = vmatmul.mubr.bf16.vlgmr.msra.gmra.mrb[0].mxu1 %v3116_v44 }
 0x14a   :  { %2697 = vmatpush3.bf16.msra.mxu1 %v3363_v42  ;;  %2692 = vmatprep.mubr.bf16.mxu1 %v3117_v45  ;;  %v3120_v42 = vld [vmem:[%s3759_s3 + $0x28] sm:$0xff]  }
 0x14b   :  { %2698 = vmatprep.subr.bf16.mxu1 %v3369_v51 }
 0x14e   :  { %2699 = vmatpush3.bf16.msra.mxu1 %v3369_v51  ;;  %v3128_v51 = vld [vmem:[%s3760_s4 + $0x60] sm:$0xff]  }
 0x14f   :  { %2700 = vmatprep.subr.bf16.mxu1 %v3375_v60  ;;  %2752 = vmatprep.subr.bf16.mxu0 %v3128_v51 }
 0x150   :  { %2753 = vmatpush3.bf16.msra.mxu0 %v3128_v51 }
 0x151   :  { %2693 = vmatmul.mubr.bf16.gmra.mrb[4].mxu1 %v3118_v33  ;;  %2754 = vmatprep.subr.bf16.mxu0 %v3131_v53 }
 0x152   :  { %2701 = vmatpush3.bf16.msra.mxu1 %v3375_v60  ;;  %2712 = vmatprep.mubr.bf16.mxu1 %v3119_v46  ;;  %v3137_v60 = vld [vmem:[%s3760_s4 + $0x78] sm:$0xff]  }
 0x153   :  { %2702 = vmatprep.subr.bf16.mxu1 %v374_v5 }
 0x154   :  { %2755 = vmatpush3.bf16.msra.mxu0 %v3131_v53 }
 0x155   :  { %2756 = vmatprep.subr.bf16.mxu0 %v3134_v56 }
 0x156   :  { %2703 = vmatpush3.bf16.msra.mxu1 %v374_v5 }
 0x157   :  { %2704 = vmatprep.subr.bf16.mxu1 %v375_v14 }
 0x158   :  { %2757 = vmatpush3.bf16.msra.mxu0 %v3134_v56  ;;  %v3141_v56 = vld [vmem:[%s3762_s5 + $0x10] sm:$0xff]  }
 0x159   :  { %2758 = vmatprep.subr.bf16.mxu0 %v3137_v60 }
 0x15a   :  { %2705 = vmatpush3.bf16.msra.mxu1 %v375_v14 }
 0x15b   :  { %2706 = vmatprep.subr.bf16.mxu1 %v376_v23 }
 0x15c   :  { %2759 = vmatpush3.bf16.msra.mxu0 %v3137_v60  ;;  %v3145_v60 = vld [vmem:[%s3762_s5 + $0x30] sm:$0xff]  }
 0x15e   :  { %2707 = vmatpush3.bf16.msra.mxu1 %v376_v23 }
 0x15f   :  { %2708 = vmatprep.subr.bf16.mxu1 %v377_v32 }
 0x162   :  { %2709 = vmatpush3.bf16.msra.mxu1 %v377_v32 }
 0x163   :  { %2710 = vmatprep.subr.bf16.mxu1 %v378_v43 }
 0x166   :  { %2711 = vmatpush3.bf16.msra.mxu1 %v378_v43 }
 0x167   :  { %2720 = vmatprep.subr.bf16.mxu1 %v3127_v50 }
 0x169   :  { %2713 = vmatmul.mubr.bf16.vlgmr.msra.gmra.mrb[8].mxu1 %v3120_v42 }
 0x16a   :  { %2716 = vmatprep.mubr.bf16.mxu1 %v3121_v47  ;;  %2721 = vmatpush3.bf16.msra.mxu1 %v3127_v50 }
 0x16b   :  { %2722 = vmatprep.subr.bf16.mxu1 %v3129_v52 }
 0x16e   :  { %2723 = vmatpush3.bf16.msra.mxu1 %v3129_v52 }
 0x16f   :  { %2724 = vmatprep.subr.bf16.mxu1 %v3130_v54 }
 0x171   :  { %2717 = vmatmul.mubr.bf16.gmra.mrb[12].mxu1 %v3122_v48 }
 0x172   :  { %2725 = vmatpush3.bf16.msra.mxu1 %v3130_v54 }
 0x173   :  { %2726 = vmatprep.subr.bf16.mxu1 %v3132_v55 }
 0x176   :  { %2727 = vmatpush3.bf16.msra.mxu1 %v3132_v55  ;;  %v3140_v55 = vld [vmem:[%s3762_s5 + $0x8] sm:$0xff]  }
 0x177   :  { %2728 = vmatprep.subr.bf16.mxu1 %v3133_v57 }
 0x17a   :  { %2729 = vmatpush3.bf16.msra.mxu1 %v3133_v57  ;;  %v3142_v57 = vld [vmem:[%s3762_s5 + $0x18] sm:$0xff]  }
 0x17b   :  { %2730 = vmatprep.subr.bf16.mxu1 %v3135_v58 }
 0x17e   :  { %2731 = vmatpush3.bf16.msra.mxu1 %v3135_v58  ;;  %v3143_v58 = vld [vmem:[%s3762_s5 + $0x20] sm:$0xff]  }
 0x17f   :  { %2732 = vmatprep.subr.bf16.mxu1 %v3136_v59 }
 0x182   :  { %2733 = vmatpush3.bf16.msra.mxu1 %v3136_v59  ;;  %v3144_v59 = vld [vmem:[%s3762_s5 + $0x28] sm:$0xff]  }
 0x183   :  { %2734 = vmatprep.subr.bf16.mxu1 %v3138_v61 }
 0x186   :  { %2735 = vmatpush3.bf16.msra.mxu1 %v3138_v61  ;;  %v3146_v61 = vld [vmem:[%s3762_s5 + $0x38] sm:$0xff]  }
 0x21c   :  { %v2690_v62 = vpop.f32.mrb[0].mxu1 }
 0x21d   :  { %v445_v63 = vpop.f32.mrb[1].mxu1 }
 0x21e   :  { %v2691_v0 = vpop.f32.mrb[2].mxu1 }
 0x21f   :  { %v448_v1 = vpop.f32.mrb[3].mxu1 }
 0x224   :  { %v2694_v2 = vpop.f32.mrb[4].mxu1 }
 0x225   :  { %v461_v3 = vpop.f32.mrb[5].mxu1 }
 0x226   :  { %v2695_v4 = vpop.f32.mrb[6].mxu1 }
 0x227   :  { %v464_v5 = vpop.f32.mrb[7].mxu1 }
 0x23c   :  { %v2714_v6 = vpop.f32.mrb[8].mxu1 }
 0x23d   :  { %v576_v7 = vmax.f32 %v2690_v62, %v2714_v6  ;;  %v543_v8 = vpop.f32.mrb[9].mxu1  ;;  %v3147_v62 = vld [vmem:[%s3762_s5 + $0x40] sm:$0xff]  }
 0x23e   :  { %v574_v9 = vmax.f32 %v445_v63, %v543_v8  ;;  %v2715_v10 = vpop.f32.mrb[10].mxu1  ;;  %v3148_v63 = vld [vmem:[%s3762_s5 + $0x48] sm:$0xff]   ;;  %v3155_v6 = vld [vmem:[%s3763_s6] sm:$0xff]  }
 0x23f   :  { %v577_v11 = vmax.f32 %v2691_v0, %v2715_v10  ;;  %v546_v12 = vpop.f32.mrb[11].mxu1  ;;  %v3149_v0 = vld [vmem:[%s3762_s5 + $0x50] sm:$0xff]  }
 0x240   :  { %v575_v13 = vmax.f32 %v448_v1, %v546_v12  ;;  %v3150_v1 = vld [vmem:[%s3762_s5 + $0x58] sm:$0xff]  }
 0x241   :  { %v583_v14 = vpack.c.bf16 %v577_v11, %v576_v7 }
 0x242   :  { %v582_v15 = vpack.c.bf16 %v575_v13, %v574_v9 }
 0x244   :  { %v2718_v16 = vpop.f32.mrb[12].mxu1  ;;  %2736 = vmatprep.mubr.bf16.mxu1 %v582_v15  ;;  %2760 = vmatprep.mubr.bf16.mxu0 %v582_v15 }
 0x245   :  { %v580_v17 = vmax.f32 %v2694_v2, %v2718_v16  ;;  %v559_v18 = vpop.f32.mrb[13].mxu1  ;;  %2737 = vmatmul.mubr.bf16.vlgmr.msra.gmra.mrb[16].mxu1 %v583_v14  ;;  %2761 = vmatmul.mubr.bf16.vlgmr.msra.gmra.mrb[32].mxu0 %v583_v14  ;;  %v3151_v2 = vld [vmem:[%s3763_s6 + $0x20] sm:$0xff]  }
 0x246   :  { %v578_v19 = vmax.f32 %v461_v3, %v559_v18  ;;  %v2719_v20 = vpop.f32.mrb[14].mxu1  ;;  %2800 = vmatprep.subr.bf16.mxu1 %v3151_v2  ;;  %v3152_v3 = vld [vmem:[%s3763_s6 + $0x28] sm:$0xff]  }
 0x247   :  { %v581_v21 = vmax.f32 %v2695_v4, %v2719_v20  ;;  %v562_v22 = vpop.f32.mrb[15].mxu1  ;;  %2801 = vmatpush3.bf16.msra.mxu1 %v3151_v2  ;;  %v3153_v4 = vld [vmem:[%s3763_s6 + $0x30] sm:$0xff]  }
 0x248   :  { %v579_v23 = vmax.f32 %v464_v5, %v562_v22  ;;  %2802 = vmatprep.subr.bf16.mxu1 %v3152_v3  ;;  %v3154_v5 = vld [vmem:[%s3763_s6 + $0x38] sm:$0xff]  }
 0x249   :  { %v585_v24 = vpack.c.bf16 %v581_v21, %v580_v17 }
 0x24a   :  { %v584_v25 = vpack.c.bf16 %v579_v23, %v578_v19 }
 0x24b   :  { %2803 = vmatpush3.bf16.msra.mxu1 %v3152_v3 }
 0x24c   :  { %2740 = vmatprep.mubr.bf16.mxu1 %v584_v25  ;;  %2764 = vmatprep.mubr.bf16.mxu0 %v584_v25  ;;  %v3156_v25 = vld [vmem:[%s3763_s6 + $0x8] sm:$0xff]  }
 0x24d   :  { %2741 = vmatmul.mubr.bf16.gmra.mrb[20].mxu1 %v585_v24  ;;  %2765 = vmatmul.mubr.bf16.gmra.mrb[36].mxu0 %v585_v24 }
 0x24e   :  { %2776 = vmatprep.mubr.msk.bf16.mxu0 %vm233_vm0, %v3139_v26  ;;  %2804 = vmatprep.subr.bf16.mxu1 %v3153_v4 }
 0x24f   :  { %2805 = vmatpush3.bf16.msra.mxu1 %v3153_v4 }
 0x250   :  { %2806 = vmatprep.subr.bf16.mxu1 %v3154_v5 }
 0x253   :  { %2807 = vmatpush3.bf16.msra.mxu1 %v3154_v5 }
 0x254   :  { %2816 = vmatprep.subr.bf16.mxu1 %v3155_v6 }
 0x318   :  { %v2738_v27 = vpop.f32.mrb[16].mxu1  ;;  %v2762_v28 = vpop.f32.mrb[32].mxu0 }
 0x319   :  { %v847_v29 = vmax.f32 %v2738_v27, %v2762_v28  ;;  %v684_v30 = vpop.f32.mrb[17].mxu1  ;;  %v814_v31 = vpop.f32.mrb[33].mxu0  ;;  %v3157_v28 = vld [vmem:[%s3763_s6 + $0x10] sm:$0xff]  }
 0x31a   :  { %v845_v32 = vmax.f32 %v684_v30, %v814_v31  ;;  %v2739_v34 = vpop.f32.mrb[18].mxu1  ;;  %v2763_v35 = vpop.f32.mrb[34].mxu0 }
 0x31b   :  { %v848_v36 = vmax.f32 %v2739_v34, %v2763_v35  ;;  %v687_v37 = vpop.f32.mrb[19].mxu1  ;;  %v817_v38 = vpop.f32.mrb[35].mxu0  ;;  %v3158_v34 = vld [vmem:[%s3763_s6 + $0x18] sm:$0xff]  }
 0x31c   :  { %v846_v39 = vmax.f32 %v687_v37, %v817_v38 }
 0x31d   :  { %v854_v40 = vpack.c.bf16 %v848_v36, %v847_v29  ;;  %v3159_v36 = vld [vmem:[%s3763_s6 + $0x40] sm:$0xff]  }
 0x31e   :  { %v853_v41 = vpack.c.bf16 %v846_v39, %v845_v32 }
 0x320   :  { %v2742_v43 = vpop.f32.mrb[20].mxu1  ;;  %v2766_v44 = vpop.f32.mrb[36].mxu0  ;;  %2768 = vmatprep.subr.bf16.mxu0 %v853_v41 }
 0x321   :  { %v851_v45 = vmax.f32 %v2742_v43, %v2766_v44  ;;  %v700_v33 = vpop.f32.mrb[21].mxu1  ;;  %v830_v46 = vpop.f32.mrb[37].mxu0  ;;  %2769 = vmatpush3.bf16.msra.mxu0 %v853_v41  ;;  %v3160_v43 = vld [vmem:[%s3763_s6 + $0x48] sm:$0xff]  }
 0x322   :  { %v849_v42 = vmax.f32 %v700_v33, %v830_v46  ;;  %v2743_v47 = vpop.f32.mrb[22].mxu1  ;;  %v2767_v48 = vpop.f32.mrb[38].mxu0  ;;  %2770 = vmatprep.subr.bf16.mxu0 %v854_v40 }
 0x323   :  { %v852_v49 = vmax.f32 %v2743_v47, %v2767_v48  ;;  %v703_v50 = vpop.f32.mrb[23].mxu1  ;;  %v833_v51 = vpop.f32.mrb[39].mxu0 }
 0x324   :  { %v850_v52 = vmax.f32 %v703_v50, %v833_v51  ;;  %v3163_v50 = vld [vmem:[%s3764_s8] sm:$0xff]  }
 0x325   :  { %v856_v53 = vpack.c.bf16 %v852_v49, %v851_v45  ;;  %2771 = vmatpush3.bf16.msra.mxu0 %v854_v40  ;;  %v3161_v45 = vld [vmem:[%s3763_s6 + $0x50] sm:$0xff]   ;;  %v3162_v49 = vld [vmem:[%s3763_s6 + $0x58] sm:$0xff]   ;;  %v3167_v51 = vld [vmem:[%s3765_s9] sm:$0xff]  }
 0x326   :  { %v855_v54 = vpack.c.bf16 %v850_v52, %v849_v42  ;;  %v3169_v52 = vld [vmem:[%s3765_s9 + $0x8] sm:$0xff]  }
 0x328   :  { %2772 = vmatprep.subr.bf16.mxu0 %v855_v54 }
 0x329   :  { %2773 = vmatpush3.bf16.msra.mxu0 %v855_v54 }
 0x32a   :  { %2774 = vmatprep.subr.bf16.mxu0 %v856_v53 }
 0x32d   :  { %2775 = vmatpush3.bf16.msra.mxu0 %v856_v53 }
 0x32e   :  { %2784 = vmatprep.subr.bf16.mxu0 %v853_v41 }
 0x330   :  { %2777 = vmatmul.mubr.msk.bf16.vlgmr.msra.gmra.mrb[40].mxu0 %vm233_vm0, %v3140_v55 }
 0x331   :  { %2785 = vmatpush3.bf16.msra.mxu0 %v853_v41  ;;  %2780 = vmatprep.mubr.msk.bf16.mxu0 %vm233_vm0, %v3141_v56 }
 0x332   :  { %2786 = vmatprep.subr.bf16.mxu0 %v854_v40 }
 0x335   :  { %2787 = vmatpush3.bf16.msra.mxu0 %v854_v40 }
 0x336   :  { %2788 = vmatprep.subr.bf16.mxu0 %v855_v54 }
 0x338   :  { %2781 = vmatmul.mubr.msk.bf16.gmra.mrb[44].mxu0 %vm233_vm0, %v3142_v57 }
 0x339   :  { %2789 = vmatpush3.bf16.msra.mxu0 %v855_v54  ;;  %2792 = vmatprep.mubr.msk.bf16.mxu0 %vm233_vm0, %v3143_v58 }
 0x33a   :  { %2790 = vmatprep.subr.bf16.mxu0 %v856_v53 }
 0x33d   :  { %2791 = vmatpush3.bf16.msra.mxu0 %v856_v53 }
 0x33e   :  { %2832 = vmatprep.subr.bf16.mxu0 %v853_v41 }
 0x340   :  { %2793 = vmatmul.mubr.msk.bf16.vlgmr.msra.gmra.mrb[48].mxu0 %vm233_vm0, %v3144_v59 }
 0x341   :  { %2833 = vmatpush3.bf16.msra.mxu0 %v853_v41  ;;  %2796 = vmatprep.mubr.msk.bf16.mxu0 %vm233_vm0, %v3145_v60 }
 0x342   :  { %2834 = vmatprep.subr.bf16.mxu0 %v854_v40 }
 0x345   :  { %2835 = vmatpush3.bf16.msra.mxu0 %v854_v40 }
 0x346   :  { %2836 = vmatprep.subr.bf16.mxu0 %v855_v54 }
 0x348   :  { %2797 = vmatmul.mubr.msk.bf16.gmra.mrb[52].mxu0 %vm233_vm0, %v3146_v61 }
 0x349   :  { %2837 = vmatpush3.bf16.msra.mxu0 %v855_v54  ;;  %2840 = vmatprep.mubr.msk.bf16.mxu0 %vm233_vm0, %v3147_v62 }
 0x34a   :  { %2838 = vmatprep.subr.bf16.mxu0 %v856_v53 }
 0x34d   :  { %2839 = vmatpush3.bf16.msra.mxu0 %v856_v53  ;;  %v2434_v53 = vld [vmem:[%s3766_s7] ss:$0 sm:$0xff] }
 0x350   :  { %2841 = vmatmul.mubr.msk.bf16.vlgmr.msra.gmra.mrb[56].mxu0 %vm233_vm0, %v3148_v63 }
 0x351   :  { %2844 = vmatprep.mubr.msk.bf16.mxu0 %vm233_vm0, %v3149_v0 }
 0x358   :  { %2845 = vmatmul.mubr.msk.bf16.gmra.mrb[60].mxu0 %vm233_vm0, %v3150_v1 }
 0x359   :  { %2872 = vmatprep.mubr.msk.bf16.mxu0 %vm233_vm0, %v3163_v50 }
 0x403   :  { %v2778_v7 = vpop.f32.mrb[40].mxu0 }
 0x404   :  { %v931_v8 = vpop.f32.mrb[41].mxu0 }
 0x405   :  { %v2779_v9 = vpop.f32.mrb[42].mxu0 }
 0x406   :  { %v963_v10 = vpack.c.bf16 %v2779_v9, %v2778_v7  ;;  %v934_v11 = vpop.f32.mrb[43].mxu0 }
 0x407   :  { %v962_v12 = vpack.c.bf16 %v934_v11, %v931_v8 }
 0x40b   :  { %v2782_v13 = vpop.f32.mrb[44].mxu0 }
 0x40c   :  { %v947_v14 = vpop.f32.mrb[45].mxu0 }
 0x40d   :  { %v2783_v15 = vpop.f32.mrb[46].mxu0 }
 0x40e   :  { %v965_v16 = vpack.c.bf16 %v2783_v15, %v2782_v13  ;;  %v950_v17 = vpop.f32.mrb[47].mxu0 }
 0x40f   :  { %v964_v18 = vpack.c.bf16 %v950_v17, %v947_v14 }
 0x413   :  { %v2794_v19 = vpop.f32.mrb[48].mxu0 }
 0x414   :  { %v1049_v20 = vpop.f32.mrb[49].mxu0 }
 0x415   :  { %v2795_v21 = vpop.f32.mrb[50].mxu0 }
 0x416   :  { %v1081_v22 = vpack.c.bf16 %v2795_v21, %v2794_v19  ;;  %v1052_v23 = vpop.f32.mrb[51].mxu0  ;;  %v3165_v19 = vld [vmem:[%s3764_s8 + $0x10] sm:$0xff]   ;;  %v3166_v21 = vld [vmem:[%s3764_s8 + $0x18] sm:$0xff]  }
 0x417   :  { %v1080_v24 = vpack.c.bf16 %v1052_v23, %v1049_v20  ;;  %v3168_v20 = vld [vmem:[%s3765_s9 + $0x40] sm:$0xff]   ;;  %v3171_v23 = vld [vmem:[%s3765_s9 + $0x10] sm:$0xff]  }
 0x419   :  { %2808 = vmatprep.mubr.msk.bf16.mxu1 %vm233_vm0, %v1080_v24  ;;  %v3172_v24 = vld [vmem:[%s3765_s9 + $0x50] sm:$0xff]  }
 0x41a   :  { %2809 = vmatmul.mubr.msk.bf16.vlgmr.msra.gmra.mrb[24].mxu1 %vm233_vm0, %v1081_v22  ;;  %v3170_v22 = vld [vmem:[%s3765_s9 + $0x48] sm:$0xff]  }
 0x41b   :  { %v2798_v26 = vpop.f32.mrb[52].mxu0  ;;  %2817 = vmatpush3.bf16.msra.mxu1 %v3155_v6 }
 0x41c   :  { %v1065_v27 = vpop.f32.mrb[53].mxu0  ;;  %2818 = vmatprep.subr.bf16.mxu1 %v3156_v25 }
 0x41d   :  { %v2799_v29 = vpop.f32.mrb[54].mxu0 }
 0x41e   :  { %v1083_v30 = vpack.c.bf16 %v2799_v29, %v2798_v26  ;;  %v1068_v31 = vpop.f32.mrb[55].mxu0  ;;  %v3174_v26 = vld [vmem:[%s3765_s9 + $0x58] sm:$0xff]   ;;  %v3177_v29 = vld [vmem:[%s3765_s9 + $0x28] sm:$0xff]  }
 0x41f   :  { %v1082_v32 = vpack.c.bf16 %v1068_v31, %v1065_v27  ;;  %2819 = vmatpush3.bf16.msra.mxu1 %v3156_v25  ;;  %v3173_v25 = vld [vmem:[%s3765_s9 + $0x18] sm:$0xff]   ;;  %v3175_v27 = vld [vmem:[%s3765_s9 + $0x20] sm:$0xff]   ;;  %v3179_v31 = vld [vmem:[%s3765_s9 + $0x30] sm:$0xff]  }
 0x420   :  { %2820 = vmatprep.subr.bf16.mxu1 %v3157_v28 }
 0x421   :  { %2812 = vmatprep.mubr.msk.bf16.mxu1 %vm233_vm0, %v1082_v32  ;;  %v3180_v32 = vld [vmem:[%s3765_s9 + $0x70] sm:$0xff]  }
 0x422   :  { %2813 = vmatmul.mubr.msk.bf16.gmra.mrb[28].mxu1 %vm233_vm0, %v1083_v30  ;;  %v3178_v30 = vld [vmem:[%s3765_s9 + $0x68] sm:$0xff]  }
 0x423   :  { %2821 = vmatpush3.bf16.msra.mxu1 %v3157_v28  ;;  %2824 = vmatprep.mubr.msk.bf16.mxu1 %vm233_vm0, %v962_v12  ;;  %v2842_v35 = vpop.f32.mrb[56].mxu0  ;;  %v3176_v28 = vld [vmem:[%s3765_s9 + $0x60] sm:$0xff]  }
 0x424   :  { %2822 = vmatprep.subr.bf16.mxu1 %v3158_v34  ;;  %v1370_v37 = vpop.f32.mrb[57].mxu0 }
 0x425   :  { %v2843_v38 = vpop.f32.mrb[58].mxu0 }
 0x426   :  { %v1402_v39 = vpack.c.bf16 %v2843_v38, %v2842_v35  ;;  %v1373_v40 = vpop.f32.mrb[59].mxu0  ;;  %v3182_v35 = vld [vmem:[%s3765_s9 + $0x78] sm:$0xff]  }
 0x427   :  { %2823 = vmatpush3.bf16.msra.mxu1 %v3158_v34  ;;  %v1401_v41 = vpack.c.bf16 %v1373_v40, %v1370_v37  ;;  %v3181_v34 = vld [vmem:[%s3765_s9 + $0x38] sm:$0xff]  }
 0x428   :  { %2848 = vmatprep.subr.bf16.mxu1 %v3159_v36 }
 0x42a   :  { %2825 = vmatmul.mubr.msk.bf16.vlgmr.msra.gmra.mrb[24].mxu1 %vm233_vm0, %v963_v10 }
 0x42b   :  { %2828 = vmatprep.mubr.msk.bf16.mxu1 %vm233_vm0, %v964_v18  ;;  %2849 = vmatpush3.bf16.msra.mxu1 %v3159_v36  ;;  %v2846_v44 = vpop.f32.mrb[60].mxu0  ;;  %v3164_v18 = vld [vmem:[%s3764_s8 + $0x8] sm:$0xff]   ;;  %v3184_v36 = vmov 0.0|0.0  }
 0x42c   :  { %2850 = vmatprep.subr.bf16.mxu1 %v3160_v43  ;;  %v1386_v33 = vpop.f32.mrb[61].mxu0 }
 0x42d   :  { %v2847_v46 = vpop.f32.mrb[62].mxu0 }
 0x42e   :  { %v1404_v42 = vpack.c.bf16 %v2847_v46, %v2846_v44  ;;  %v1389_v47 = vpop.f32.mrb[63].mxu0 }
 0x42f   :  { %2851 = vmatpush3.bf16.msra.mxu1 %v3160_v43  ;;  %v1403_v48 = vpack.c.bf16 %v1389_v47, %v1386_v33  ;;  %v1927_v47 = vld [vmem:[%s3767_s10] sm:$0xff] }
 0x430   :  { %2852 = vmatprep.subr.bf16.mxu1 %v3161_v45 }
 0x432   :  { %2829 = vmatmul.mubr.msk.bf16.gmra.mrb[28].mxu1 %vm233_vm0, %v965_v16 }
 0x433   :  { %2853 = vmatpush3.bf16.msra.mxu1 %v3161_v45  ;;  %2856 = vmatprep.mubr.msk.bf16.mxu1 %vm233_vm0, %v1401_v41 }
 0x434   :  { %2854 = vmatprep.subr.bf16.mxu1 %v3162_v49 }
 0x437   :  { %2855 = vmatpush3.bf16.msra.mxu1 %v3162_v49 }
 0x438   :  { %2888 = vmatprep.subr.bf16.mxu1 %v3167_v51 }
 0x43a   :  { %2857 = vmatmul.mubr.msk.bf16.vlgmr.msra.gmra.mrb[24].mxu1 %vm233_vm0, %v1402_v39 }
 0x43b   :  { %2860 = vmatprep.mubr.msk.bf16.mxu1 %vm233_vm0, %v1403_v48  ;;  %2889 = vmatpush3.bf16.msra.mxu1 %v3167_v51  ;;  %v1928_v48 = vld [vmem:[%s3767_s10 + $0x8] sm:$0xff] }
 0x43c   :  { %2890 = vmatprep.subr.bf16.mxu1 %v3169_v52 }
 0x43f   :  { %2891 = vmatpush3.bf16.msra.mxu1 %v3169_v52  ;;  %v3005_v52 = vpack.c.bf16 %v1928_v48, %v1927_v47  ;;  %v2480_v48 = vld [vmem:[%s3768_s11] ss:$0 sm:$0xff] }
 0x440   :  { %2892 = vmatprep.subr.bf16.mxu1 %v3171_v23 }
 0x442   :  { %2861 = vmatmul.mubr.msk.bf16.gmra.mrb[28].mxu1 %vm233_vm0, %v1404_v42 }
 0x443   :  { %2893 = vmatpush3.bf16.msra.mxu1 %v3171_v23  ;;  %v2490_v23 = vld [vmem:[%s3767_s10 + $0x80] sm:$0xff] }
 0x444   :  { %2894 = vmatprep.subr.bf16.mxu1 %v3173_v25 }
 0x447   :  { %2895 = vmatpush3.bf16.msra.mxu1 %v3173_v25 }
 0x448   :  { %2896 = vmatprep.subr.bf16.mxu1 %v3175_v27 }
 0x44b   :  { %2897 = vmatpush3.bf16.msra.mxu1 %v3175_v27  ;;  %v2493_v27 = vld [vmem:[%s3767_s10 + $0x98] sm:$0xff] }
 0x44c   :  { %2898 = vmatprep.subr.bf16.mxu1 %v3177_v29 }
 0x44f   :  { %2899 = vmatpush3.bf16.msra.mxu1 %v3177_v29  ;;  %v2494_v29 = vld [vmem:[%s3767_s10 + $0xa0] sm:$0xff] }
 0x450   :  { %2900 = vmatprep.subr.bf16.mxu1 %v3179_v31 }
 0x453   :  { %2901 = vmatpush3.bf16.msra.mxu1 %v3179_v31 }
 0x454   :  { %2902 = vmatprep.subr.bf16.mxu1 %v3181_v34 }
 0x457   :  { %2903 = vmatpush3.bf16.msra.mxu1 %v3181_v34  ;;  %v2497_v34 = vld [vmem:[%s3767_s10 + $0xb8] sm:$0xff] }
 0x458   :  { %3004 = vmatprep.subr.bf16.mxu1 %v3184_v36 }
 0x50d   :  { %v2858_v54 = vpop.f32.mrb[24].mxu1 }
 0x50e   :  { %v1532_v55 = vadd.f32 %v2858_v54, %v2434_v53  ;;  %v1484_v56 = vpop.f32.mrb[25].mxu1  ;;  %v1930_v54 = vld [vmem:[%s3767_s10 + $0x18] sm:$0xff] }
 0x50f   :  { %v1530_v57 = vadd.f32 %v2434_v53, %v1484_v56  ;;  %v2859_v58 = vpop.f32.mrb[26].mxu1  ;;  %v1931_v56 = vld [vmem:[%s3767_s10 + $0x20] sm:$0xff] }
 0x510   :  { %v1533_v59 = vadd.f32 %v2859_v58, %v2434_v53  ;;  %v1487_v60 = vpop.f32.mrb[27].mxu1  ;;  %v1540_v62 = vmax.f32 %v1532_v55, 0.0 }
 0x511   :  { %v1531_v61 = vadd.f32 %v2434_v53, %v1487_v60  ;;  %v1538_v0 = vmax.f32 %v1530_v57, 0.0  ;;  %v1932_v57 = vld [vmem:[%s3767_s10 + $0x28] sm:$0xff]  ;;  %v1934_v60 = vld [vmem:[%s3767_s10 + $0x38] sm:$0xff] }
 0x512   :  { %v1541_v63 = vmax.f32 %v1533_v59, 0.0  ;;  %v3011_v58 = vpack.c.bf16 %v1932_v57, %v1931_v56  ;;  %v1933_v59 = vld [vmem:[%s3767_s10 + $0x30] sm:$0xff] }
 0x513   :  { %v1539_v1 = vmax.f32 %v1531_v61, 0.0  ;;  %v3014_v61 = vpack.c.bf16 %v1934_v60, %v1933_v59 }
 0x514   :  { %v1547_v2 = vpack.c.bf16 %v1541_v63, %v1540_v62  ;;  %v3186_v62 = vmov 0.0   ;;  %v2481_v63 = vld [vmem:[%s3767_s10 + $0x40] sm:$0xff] }
 0x515   :  { %v1546_v3 = vpack.c.bf16 %v1539_v1, %v1538_v0  ;;  %v2862_v4 = vpop.f32.mrb[28].mxu1  ;;  %v2482_v0 = vld [vmem:[%s3767_s10 + $0x48] sm:$0xff] }
 0x516   :  { %v1536_v5 = vadd.f32 %v2862_v4, %v2434_v53  ;;  %v1500_v6 = vpop.f32.mrb[29].mxu1 }
 0x517   :  { %v1534_v7 = vadd.f32 %v2434_v53, %v1500_v6  ;;  %v2863_v8 = vpop.f32.mrb[30].mxu1  ;;  %2864 = vmatprep.subr.bf16.mxu0 %v1546_v3  ;;  %v3017_v6 = vpack.c.bf16 %v2482_v0, %v2481_v63 }
 0x518   :  { %v1537_v9 = vadd.f32 %v2863_v8, %v2434_v53  ;;  %v1503_v10 = vpop.f32.mrb[31].mxu1  ;;  %2865 = vmatpush3.bf16.msra.mxu0 %v1546_v3  ;;  %v1544_v12 = vmax.f32 %v1536_v5, 0.0 }
 0x519   :  { %v1535_v11 = vadd.f32 %v2434_v53, %v1503_v10  ;;  %2866 = vmatprep.subr.bf16.mxu0 %v1547_v2  ;;  %v1542_v14 = vmax.f32 %v1534_v7, 0.0  ;;  %v1929_v53 = vld [vmem:[%s3767_s10 + $0x10] sm:$0xff] }
 0x51a   :  { %v1545_v13 = vmax.f32 %v1537_v9, 0.0  ;;  %v3008_v55 = vpack.c.bf16 %v1930_v54, %v1929_v53  ;;  %v2483_v10 = vld [vmem:[%s3767_s10 + $0x50] sm:$0xff] }
 0x51b   :  { %v1543_v15 = vmax.f32 %v1535_v11, 0.0  ;;  %v2484_v11 = vld [vmem:[%s3767_s10 + $0x58] sm:$0xff] }
 0x51c   :  { %v1549_v16 = vpack.c.bf16 %v1545_v13, %v1544_v12  ;;  %2867 = vmatpush3.bf16.msra.mxu0 %v1547_v2 }
 0x51d   :  { %v1548_v17 = vpack.c.bf16 %v1543_v15, %v1542_v14 }
 0x51f   :  { %2868 = vmatprep.subr.bf16.mxu0 %v1548_v17 }
 0x520   :  { %2869 = vmatpush3.bf16.msra.mxu0 %v1548_v17 }
 0x521   :  { %2870 = vmatprep.subr.bf16.mxu0 %v1549_v16 }
 0x524   :  { %2871 = vmatpush3.bf16.msra.mxu0 %v1549_v16 }
 0x525   :  { %2876 = vmatprep.subr.bf16.mxu0 %v1546_v3 }
 0x527   :  { %2873 = vmatmul.mubr.msk.bf16.vlgmr.msra.gmra.mrb[64].mxu0 %vm233_vm0, %v3164_v18  ;;  %v2486_v18 = vld [vmem:[%s3767_s10 + $0x68] sm:$0xff] }
 0x528   :  { %2877 = vmatpush3.bf16.msra.mxu0 %v1546_v3  ;;  %2884 = vmatprep.mubr.msk.bf16.mxu0 %vm233_vm0, %v3165_v19 }
 0x529   :  { %2878 = vmatprep.subr.bf16.mxu0 %v1547_v2 }
 0x52c   :  { %2879 = vmatpush3.bf16.msra.mxu0 %v1547_v2 }
 0x52d   :  { %2880 = vmatprep.subr.bf16.mxu0 %v1548_v17 }
 0x530   :  { %2881 = vmatpush3.bf16.msra.mxu0 %v1548_v17  ;;  %v2485_v17 = vld [vmem:[%s3767_s10 + $0x60] sm:$0xff] }
 0x531   :  { %2882 = vmatprep.subr.bf16.mxu0 %v1549_v16  ;;  %v3023_v19 = vpack.c.bf16 %v2486_v18, %v2485_v17 }
 0x534   :  { %2883 = vmatpush3.bf16.msra.mxu0 %v1549_v16  ;;  %v3020_v16 = vpack.c.bf16 %v2484_v11, %v2483_v10 }
 0x535   :  { %2908 = vmatprep.subr.bf16.mxu0 %v3168_v20 }
 0x537   :  { %2885 = vmatmul.mubr.msk.bf16.vlgmr.msra.gmra.mrb[68].mxu0 %vm233_vm0, %v3166_v21  ;;  %v2488_v21 = vld [vmem:[%s3767_s10 + $0x78] sm:$0xff] }
 0x538   :  { %2909 = vmatpush3.bf16.msra.mxu0 %v3168_v20  ;;  %v2487_v20 = vld [vmem:[%s3767_s10 + $0x70] sm:$0xff] }
 0x539   :  { %2910 = vmatprep.subr.bf16.mxu0 %v3170_v22 }
 0x53c   :  { %2911 = vmatpush3.bf16.msra.mxu0 %v3170_v22  ;;  %v3026_v22 = vpack.c.bf16 %v2488_v21, %v2487_v20 }
 0x53d   :  { %2912 = vmatprep.subr.bf16.mxu0 %v3172_v24 }
 0x540   :  { %2913 = vmatpush3.bf16.msra.mxu0 %v3172_v24  ;;  %v2491_v24 = vld [vmem:[%s3767_s10 + $0x88] sm:$0xff] }
 0x541   :  { %2914 = vmatprep.subr.bf16.mxu0 %v3174_v26  ;;  %v3029_v25 = vpack.c.bf16 %v2491_v24, %v2490_v23 }
 0x544   :  { %2915 = vmatpush3.bf16.msra.mxu0 %v3174_v26  ;;  %v2492_v26 = vld [vmem:[%s3767_s10 + $0x90] sm:$0xff] }
 0x545   :  { %2916 = vmatprep.subr.bf16.mxu0 %v3176_v28 }
 0x548   :  { %2917 = vmatpush3.bf16.msra.mxu0 %v3176_v28  ;;  %v3032_v28 = vpack.c.bf16 %v2493_v27, %v2492_v26 }
 0x549   :  { %2918 = vmatprep.subr.bf16.mxu0 %v3178_v30 }
 0x54c   :  { %2919 = vmatpush3.bf16.msra.mxu0 %v3178_v30  ;;  %v2495_v30 = vld [vmem:[%s3767_s10 + $0xa8] sm:$0xff] }
 0x54d   :  { %2920 = vmatprep.subr.bf16.mxu0 %v3180_v32  ;;  %v3035_v31 = vpack.c.bf16 %v2495_v30, %v2494_v29 }
 0x550   :  { %2921 = vmatpush3.bf16.msra.mxu0 %v3180_v32  ;;  %v2496_v32 = vld [vmem:[%s3767_s10 + $0xb0] sm:$0xff] }
 0x551   :  { %2922 = vmatprep.subr.bf16.mxu0 %v3182_v35 }
 0x554   :  { %2923 = vmatpush3.bf16.msra.mxu0 %v3182_v35  ;;  %v3038_v35 = vpack.c.bf16 %v2497_v34, %v2496_v32 }
 0x5fa   :  { %v2874_v37 = vpop.f32.mrb[64].mxu0 }
 0x5fb   :  { %v1604_v38 = vpop.f32.mrb[65].mxu0 }
 0x5fc   :  { %v2875_v39 = vpop.f32.mrb[66].mxu0 }
 0x5fd   :  { %v1607_v40 = vpop.f32.mrb[67].mxu0 }
 0x60a   :  { %v2886_v41 = vpop.f32.mrb[68].mxu0 }
 0x60b   :  { %v1691_v43 = vmax.f32 %v2874_v37, %v2886_v41  ;;  %v1674_v44 = vpop.f32.mrb[69].mxu0  ;;  %v2499_v37 = vld [vmem:[%s3767_s10 + $0xc0] sm:$0xff]  ;;  %v2502_v41 = vld [vmem:[%s3767_s10 + $0xd8] sm:$0xff] }
 0x60c   :  { %v1689_v45 = vmax.f32 %v1604_v38, %v1674_v44  ;;  %v2887_v33 = vpop.f32.mrb[70].mxu0  ;;  %v2500_v38 = vld [vmem:[%s3767_s10 + $0xc8] sm:$0xff]  ;;  %v2503_v44 = vld [vmem:[%s3767_s10 + $0xe0] sm:$0xff] }
 0x60d   :  { %v1692_v46 = vmax.f32 %v2875_v39, %v2887_v33  ;;  %v1677_v42 = vpop.f32.mrb[71].mxu0  ;;  %v3041_v39 = vpack.c.bf16 %v2500_v38, %v2499_v37 }
 0x60e   :  { %v1690_v49 = vmax.f32 %v1607_v40, %v1677_v42  ;;  %v2501_v40 = vld [vmem:[%s3767_s10 + $0xd0] sm:$0xff]  ;;  %v2506_v42 = vld [vmem:[%s3767_s10 + $0xf8] sm:$0xff] }
 0x60f   :  { %v1694_v50 = vpack.c.bf16 %v1692_v46, %v1691_v43  ;;  %v3044_v43 = vpack.c.bf16 %v2502_v41, %v2501_v40  ;;  %v2505_v46 = vld [vmem:[%s3767_s10 + $0xf0] sm:$0xff] }
 0x610   :  { %v1693_v51 = vpack.c.bf16 %v1690_v49, %v1689_v45  ;;  %v2504_v45 = vld [vmem:[%s3767_s10 + $0xe8] sm:$0xff]  ;;  %v3050_v47 = vpack.c.bf16 %v2506_v42, %v2505_v46 }
 0x611   :  { %v3047_v33 = vpack.c.bf16 %v2504_v45, %v2503_v44 }
 0x612   :  { %2904 = vmatprep.mubr.bf16.mxu1 %v1693_v51  ;;  %2924 = vmatprep.mubr.bf16.mxu0 %v1693_v51 }
 0x613   :  { %2905 = vmatmul.mubr.bf16.vlgmr.msra.gmra.mrb[32].mxu1 %v1694_v50  ;;  %2925 = vmatmul.mubr.bf16.vlgmr.msra.gmra.mrb[72].mxu0 %v1694_v50 }
 0x614   :  { %3006 = vmatpush3.bf16.msra.mxu1 %v3005_v52  ;;  %2944 = vmatprep.mubr.msk.f32.mxu1 %vm3185_vm1, %v3186_v62 }
 0x615   :  { %3007 = vmatprep.subr.bf16.mxu1 %v3184_v36 }
 0x618   :  { %3009 = vmatpush3.bf16.msra.mxu1 %v3008_v55 }
 0x619   :  { %3010 = vmatprep.subr.bf16.mxu1 %v3184_v36 }
 0x61c   :  { %3012 = vmatpush3.bf16.msra.mxu1 %v3011_v58 }
 0x61d   :  { %3013 = vmatprep.subr.bf16.mxu1 %v3184_v36 }
 0x620   :  { %3015 = vmatpush3.bf16.msra.mxu1 %v3014_v61 }
 0x621   :  { %3016 = vmatprep.subr.bf16.mxu1 %v3184_v36 }
 0x6e6   :  { %v2906_v1 = vpop.f32.mrb[32].mxu1  ;;  %v2926_v2 = vpop.f32.mrb[72].mxu0 }
 0x6e7   :  { %v1924_v3 = vmax.f32 %v2906_v1, %v2926_v2  ;;  %v1793_v4 = vpop.f32.mrb[33].mxu1  ;;  %v1907_v5 = vpop.f32.mrb[73].mxu0 }
 0x6e8   :  { %v1922_v7 = vmax.f32 %v1793_v4, %v1907_v5  ;;  %v3655_v8 = vpop.f32.mrb[34].mxu1  ;;  %v3657_v9 = vpop.f32.mrb[74].mxu0 }
 0x6e9   :  { %v1925_v12 = vmax.f32 %v3655_v8, %v3657_v9  ;;  %v1796_v13 = vpop.f32.mrb[35].mxu1  ;;  %v1910_v14 = vpop.f32.mrb[75].mxu0 }
 0x6ea   :  { %v1923_v15 = vmax.f32 %v1796_v13, %v1910_v14  ;;  %2945 = vmatmul.mubr.msk.f32.vlgmr.msra.gmra.mrb[36].mxu1 %vm233_vm0, %v1922_v7 }
 0x6eb   :  { %3018 = vmatpush3.bf16.msra.mxu1 %v3017_v6  ;;  %2963 = vmatprep.mubr.msk.f32.mxu1 %vm3185_vm1, %v3186_v62 }
 0x6ec   :  { %3019 = vmatprep.subr.bf16.mxu1 %v3184_v36 }
 0x6ef   :  { %3021 = vmatpush3.bf16.msra.mxu1 %v3020_v16 }
 0x6f0   :  { %3022 = vmatprep.subr.bf16.mxu1 %v3184_v36 }
 0x6f3   :  { %3024 = vmatpush3.bf16.msra.mxu1 %v3023_v19 }
 0x6f4   :  { %3025 = vmatprep.subr.bf16.mxu1 %v3184_v36 }
 0x6f7   :  { %3027 = vmatpush3.bf16.msra.mxu1 %v3026_v22 }
 0x6f8   :  { %3028 = vmatprep.subr.bf16.mxu1 %v3184_v36 }
 0x6fa   :  { %2964 = vmatmul.mubr.msk.f32.vlgmr.msra.gmra.mrb[36].mxu1 %vm233_vm0, %v1923_v15 }
 0x6fb   :  { %3030 = vmatpush3.bf16.msra.mxu1 %v3029_v25  ;;  %2982 = vmatprep.mubr.msk.f32.mxu1 %vm3185_vm1, %v3186_v62 }
 0x6fc   :  { %3031 = vmatprep.subr.bf16.mxu1 %v3184_v36 }
 0x6ff   :  { %3033 = vmatpush3.bf16.msra.mxu1 %v3032_v28 }
 0x700   :  { %3034 = vmatprep.subr.bf16.mxu1 %v3184_v36 }
 0x703   :  { %3036 = vmatpush3.bf16.msra.mxu1 %v3035_v31 }
 0x704   :  { %3037 = vmatprep.subr.bf16.mxu1 %v3184_v36 }
 0x707   :  { %3039 = vmatpush3.bf16.msra.mxu1 %v3038_v35 }
 0x708   :  { %3040 = vmatprep.subr.bf16.mxu1 %v3184_v36 }
 0x70a   :  { %2983 = vmatmul.mubr.msk.f32.vlgmr.msra.gmra.mrb[36].mxu1 %vm233_vm0, %v1924_v3 }
 0x70b   :  { %3042 = vmatpush3.bf16.msra.mxu1 %v3041_v39  ;;  %3001 = vmatprep.mubr.msk.f32.mxu1 %vm3185_vm1, %v3186_v62 }
 0x70c   :  { %3043 = vmatprep.subr.bf16.mxu1 %v3184_v36 }
 0x70f   :  { %3045 = vmatpush3.bf16.msra.mxu1 %v3044_v43 }
 0x710   :  { %3046 = vmatprep.subr.bf16.mxu1 %v3184_v36 }
 0x713   :  { %3048 = vmatpush3.bf16.msra.mxu1 %v3047_v33 }
 0x714   :  { %3049 = vmatprep.subr.bf16.mxu1 %v3184_v36 }
 0x717   :  { %3051 = vmatpush3.bf16.msra.mxu1 %v3050_v47 }
 0x71a   :  { %3002 = vmatmul.mubr.msk.f32.vlgmr.msra.gmra.mrb[36].mxu1 %vm233_vm0, %v1925_v12 }
 0x7ed   :  { %v2259_v49 = vpop.f32.mrb[36].mxu1 }
 0x7ee   :  { %v3052_v50 = vadd.f32 %v2480_v48, %v2259_v49  ;;  %v3003_v51 = vpop.f32.mrb[37].mxu1 }
 0x7f0   :  { %2264 = vst [vmem:[%s3769_s12] sm:$0xff] %v3052_v50 }

</bundles_post_ra>
